<compile_context>
chip_gen: v7x
topology: tpu7x:2x2x1
jax: 0.10.0
libtpu: 0.0.40
codegen_flags: <defaults>
</compile_context>

<pallas_src>
import functools

import jax
import jax.numpy as jnp
from jax.experimental import pallas as pl
from jax.experimental.pallas import tpu as pltpu


def _decoder_kernel(*refs, num_layers, seq_len, batch, hidden):
    """Multi-layer LSTM recurrence + fused Linear head (single invocation)."""
    L, T, B, H = num_layers, seq_len, batch, hidden
    has_rest = L > 1

    it = iter(refs)
    x_ref, t_ref, a_ref = next(it), next(it), next(it)          # (T*B, F*) streams
    wx_ref, wt_ref, wa_ref = next(it), next(it), next(it)       # (F*, 4H)
    wihr_ref = next(it) if has_rest else None                   # (L-1, H, 4H)
    whh_ref, b_ref = next(it), next(it)                         # (L, H, 4H), (L, 1, 4H)
    h0_ref, c0_ref = next(it), next(it)                         # (L, B, H)
    wlin_ref, blin_ref = next(it), next(it)                     # (L*H, Op), (1, Op)
    out_ref, hn_ref, cn_ref = next(it), next(it), next(it)
    seq_scratch = next(it) if has_rest else None                # (T*B, H)

    head_acc = None

    # TODO(synk): a layer/time wavefront (layer l at step s-l) would shrink the
    # dependent chain from L*T to T+L-1 steps; only worth it at larger L.
    for layer in range(L):
        bias = b_ref[layer]                                     # (1, 4H)

        # Hoisted input-to-hidden gates for the whole sequence, fused 4H-wide RHS.
        if layer == 0:
            gx = (jnp.dot(x_ref[...], wx_ref[...], preferred_element_type=jnp.float32)
                  + jnp.dot(t_ref[...], wt_ref[...], preferred_element_type=jnp.float32)
                  + jnp.dot(a_ref[...], wa_ref[...], preferred_element_type=jnp.float32)
                  + bias)                                       # (T*B, 4H)
        else:
            gx = (jnp.dot(seq_scratch[...], wihr_ref[layer - 1],
                          preferred_element_type=jnp.float32)
                  + bias)                                       # (T*B, 4H)

        whh_l = whh_ref[layer]                                  # (H, 4H)
        h = h0_ref[layer]                                       # (B, H)
        c = c0_ref[layer]                                       # (B, H)

        # Serial recurrence, fully unrolled (T compile-time known).
        # Per step: 1 fused MXU push + 3 EUP pushes (sigmoid, tanh(pre), tanh(c)).
        for t in range(T):
            r0 = t * B
            pre = gx[r0:r0 + B, :] + jnp.dot(h, whh_l,
                                             preferred_element_type=jnp.float32)
            sig = jax.nn.sigmoid(pre)                           # i, f, -, o gates
            tnh = jnp.tanh(pre)                                 # -, -, g, - gate
            i_g = sig[:, 0 * H:1 * H]
            f_g = sig[:, 1 * H:2 * H]
            g_g = tnh[:, 2 * H:3 * H]
            o_g = sig[:, 3 * H:4 * H]
            c = f_g * c + i_g * g_g
            h = o_g * jnp.tanh(c)
            if layer + 1 < L:
                seq_scratch[r0:r0 + B, :] = h                   # aligned 8-sublane store

        hn_ref[layer] = h
        cn_ref[layer] = c

        # Head as per-layer accumulation: out = sum_l h_l @ Wlin_l + b
        part = jnp.dot(h, wlin_ref[layer * H:(layer + 1) * H, :],
                       preferred_element_type=jnp.float32)
        head_acc = part if head_acc is None else head_acc + part

    out_ref[...] = head_acc + blin_ref[...]


def make_params(key, x_feat, time_feat, ang_feat, hidden, num_layers, output_size):
    """Deterministic synthetic parameters matching nn.LSTM / nn.Linear / nn.Embedding shapes."""
    d_in = x_feat + 4 * time_feat + ang_feat
    k_emb, k_lw, k_lb, key = jax.random.split(key, 4)
    params = {
        "emb": 0.1 * jax.random.normal(k_emb, (365, 4), jnp.float32),
        "lstm": [],
    }
    s = 1.0 / float(hidden) ** 0.5
    in_size = d_in
    for _ in range(num_layers):
        key, k1, k2, k3, k4 = jax.random.split(key, 5)
        params["lstm"].append(dict(
            w_ih=jax.random.uniform(k1, (4 * hidden, in_size), jnp.float32, -s, s),
            w_hh=jax.random.uniform(k2, (4 * hidden, hidden), jnp.float32, -s, s),
            b_ih=jax.random.uniform(k3, (4 * hidden,), jnp.float32, -s, s),
            b_hh=jax.random.uniform(k4, (4 * hidden,), jnp.float32, -s, s),
        ))
        in_size = hidden
    s2 = 1.0 / float(hidden * num_layers) ** 0.5
    params["lin_w"] = jax.random.uniform(k_lw, (output_size, hidden * num_layers),
                                         jnp.float32, -s2, s2)
    params["lin_b"] = jax.random.uniform(k_lb, (output_size,), jnp.float32, -s2, s2)
    return params


def decoder_net_forward(params, x, time, angle, h0, c0, *, hidden, num_layers, output_size):
    B, T, x_feat = x.shape
    H, L, O = hidden, num_layers, output_size
    H4 = 4 * H

    # Embedding lookup stays in plain JAX (dynamic gather is wrapper glue).
    t_idx = time.astype(jnp.int32)                              # time.long()
    a, b, c = t_idx.shape
    t_emb = jnp.take(params["emb"], t_idx, axis=0).reshape(a, b, c * 4)
    ft4 = t_emb.shape[-1]
    fa = angle.shape[-1]

    # Pad batch to a full 8-sublane group so all per-step state tensors and
    # seq_scratch stores in the kernel are aligned (no masked sub-vreg stores).
    Bp = max(8, ((B + 7) // 8) * 8)

    def to_time_major(arr):                                     # (B,T,F) -> (T*Bp,F)
        arr = jnp.pad(arr, ((0, Bp - B), (0, 0), (0, 0)))
        return jnp.transpose(arr, (1, 0, 2)).reshape(T * Bp, arr.shape[-1])

    x_tm = to_time_major(x)
    t_tm = to_time_major(t_emb)
    a_tm = to_time_major(angle)
    h0_p = jnp.pad(h0, ((0, 0), (0, Bp - B), (0, 0)))
    c0_p = jnp.pad(c0, ((0, 0), (0, Bp - B), (0, 0)))

    # Fused-gate weights: every RHS is (in, 4H); bias pre-folded (b_ih + b_hh).
    # Gate order along the 4H axis is PyTorch's (i, f, g, o).
    # TODO(synk): on v6e/v7x cast the weights to bfloat16 (keep fp32 accumulate)
    # to halve MXU latency on the h->h chain; kept fp32 to hold the 1e-4 check.
    wih0_t = params["lstm"][0]["w_ih"].T                        # (D_in, 4H)
    wx = wih0_t[:x_feat, :]                                     # (Fx, 4H)
    wt = wih0_t[x_feat:x_feat + ft4, :]                         # (4*Ct, 4H)
    wa = wih0_t[x_feat + ft4:, :]                               # (Fa, 4H)
    whh = jnp.stack([params["lstm"][l]["w_hh"].T for l in range(L)], axis=0)
    bias = jnp.stack([(params["lstm"][l]["b_ih"] + params["lstm"][l]["b_hh"])[None, :]
                      for l in range(L)], axis=0)               # (L, 1, 4H)

    # Lane-dense (128-padded) Linear head; wrapper slices back to O.
    o_pad = max(128, ((O + 127) // 128) * 128)
    wlin = jnp.zeros((L * H, o_pad), jnp.float32).at[:, :O].set(params["lin_w"].T)
    blin = jnp.zeros((1, o_pad), jnp.float32).at[:, :O].set(params["lin_b"])

    args = [x_tm, t_tm, a_tm, wx, wt, wa]
    if L > 1:
        wih_rest = jnp.stack([params["lstm"][l]["w_ih"].T for l in range(1, L)],
                             axis=0)                            # (L-1, H, 4H)
        args.append(wih_rest)
    args += [whh, bias, h0_p, c0_p, wlin, blin]

    d_in = x_feat + ft4 + fa
    flops = 2 * L * T * Bp * (max(d_in, H) + H) * H4 + 2 * Bp * L * H * o_pad
    transcendentals = L * T * Bp * (2 * H4 + H)
    bytes_accessed = (sum(int(v.size) * 4 for v in args)
                      + 4 * (Bp * o_pad + 2 * L * Bp * H))

    kernel = functools.partial(_decoder_kernel, num_layers=L, seq_len=T,
                               batch=Bp, hidden=H)
    vmem = pl.BlockSpec(memory_space=pltpu.MemorySpace.VMEM)
    scratch = [pltpu.VMEM((T * Bp, H), jnp.float32)] if L > 1 else []

    # TODO(synk): if B/T ever grow, add a leading batch grid axis with
    # dimension_semantics=("parallel",) and real BlockSpec tiling sized against
    # v7x's 64 MiB VMEM per TC so the work shards across both TensorCores.
    out_pad, hn_p, cn_p = pl.pallas_call(
        kernel,
        out_shape=(
            jax.ShapeDtypeStruct((Bp, o_pad), jnp.float32),
            jax.ShapeDtypeStruct((L, Bp, H), jnp.float32),
            jax.ShapeDtypeStruct((L, Bp, H), jnp.float32),
        ),
        in_specs=[vmem] * len(args),
        out_specs=(vmem, vmem, vmem),
        scratch_shapes=scratch,
        cost_estimate=pl.CostEstimate(flops=flops,
                                      transcendentals=transcendentals,
                                      bytes_accessed=bytes_accessed),
    )(*args)

    out = out_pad[:B, :O].reshape(B, 1, O)
    hn = hn_p[:, :B, :]
    cn = cn_p[:, :B, :]
    return out, hn, cn


def reference_forward(params, x, time, angle, h0, c0, *, hidden, num_layers, output_size):
    """Pure-JAX reference replicating the PyTorch forward semantics."""
    t_idx = time.astype(jnp.int32)
    a, b, c = t_idx.shape
    t_emb = jnp.take(params["emb"], t_idx, axis=0).reshape(a, b, c * 4)
    inp = jnp.concatenate([x, t_emb, angle], axis=2)
    H = hidden
    layer_in = inp
    hns, cns = [], []
    for l, lw in enumerate(params["lstm"]):
        h, c_st = h0[l], c0[l]
        outs = []
        for t in range(inp.shape[1]):
            x_t = layer_in[:, t, :]
            gates = x_t @ lw["w_ih"].T + lw["b_ih"] + h @ lw["w_hh"].T + lw["b_hh"]
            i_g = jax.nn.sigmoid(gates[:, 0 * H:1 * H])
            f_g = jax.nn.sigmoid(gates[:, 1 * H:2 * H])
            g_g = jnp.tanh(gates[:, 2 * H:3 * H])
            o_g = jax.nn.sigmoid(gates[:, 3 * H:4 * H])
            c_st = f_g * c_st + i_g * g_g
            h = o_g * jnp.tanh(c_st)
            outs.append(h)
        layer_in = jnp.stack(outs, axis=1)
        hns.append(h)
        cns.append(c_st)
    hn = jnp.stack(hns, axis=0)
    cn = jnp.stack(cns, axis=0)
    flat = jnp.transpose(hn, (1, 0, 2)).reshape(hn.shape[1], -1)
    out = flat @ params["lin_w"].T + params["lin_b"]
    return out.reshape(out.shape[0], 1, output_size), hn, cn


if __name__ == "__main__":
    B, T = 2, 8
    x_feat, time_feat, ang_feat = 8, 1, 4       # input_size = 8 + 1*4 + 4 = 16
    H, L, O = 32, 2, 6                          # hidden_size, num_layers, output_size

    key = jax.random.PRNGKey(0)
    kp, kx, kt, ka, kh, kc = jax.random.split(key, 6)
    params = make_params(kp, x_feat, time_feat, ang_feat, H, L, O)

    x = jax.random.normal(kx, (B, T, x_feat), jnp.float32)
    time = jax.random.randint(kt, (B, T, time_feat), 0, 365).astype(jnp.float32)
    angle = jax.random.normal(ka, (B, T, ang_feat), jnp.float32)
    h0 = jax.random.normal(kh, (L, B, H), jnp.float32)
    c0 = jax.random.normal(kc, (L, B, H), jnp.float32)

    out, hn, cn = decoder_net_forward(params, x, time, angle, h0, c0,
                                      hidden=H, num_layers=L, output_size=O)
    jax.block_until_ready((out, hn, cn))

    ref_out, ref_hn, ref_cn = reference_forward(params, x, time, angle, h0, c0,
                                                hidden=H, num_layers=L, output_size=O)
    assert out.shape == (B, 1, O) and hn.shape == (L, B, H) and cn.shape == (L, B, H)
    assert jnp.allclose(out, ref_out, atol=1e-4), "output mismatch"
    assert jnp.allclose(hn, ref_hn, atol=1e-4), "hn mismatch"
    assert jnp.allclose(cn, ref_cn, atol=1e-4), "cn mismatch"

    print("KERNEL_OK")
</pallas_src>

<mosaic_0001>
module attributes {stable_mosaic.version = 11 : i64} {
  func.func @_decoder_kernel(%arg0: memref<64x8xf32, #tpu.memory_space<vmem>>, %arg1: memref<64x4xf32, #tpu.memory_space<vmem>>, %arg2: memref<64x4xf32, #tpu.memory_space<vmem>>, %arg3: memref<8x128xf32, #tpu.memory_space<vmem>>, %arg4: memref<4x128xf32, #tpu.memory_space<vmem>>, %arg5: memref<4x128xf32, #tpu.memory_space<vmem>>, %arg6: memref<1x32x128xf32, #tpu.memory_space<vmem>>, %arg7: memref<2x32x128xf32, #tpu.memory_space<vmem>>, %arg8: memref<2x1x128xf32, #tpu.memory_space<vmem>>, %arg9: memref<2x8x32xf32, #tpu.memory_space<vmem>>, %arg10: memref<2x8x32xf32, #tpu.memory_space<vmem>>, %arg11: memref<64x128xf32, #tpu.memory_space<vmem>>, %arg12: memref<1x128xf32, #tpu.memory_space<vmem>>, %arg13: memref<8x128xf32, #tpu.memory_space<vmem>>, %arg14: memref<2x8x32xf32, #tpu.memory_space<vmem>>, %arg15: memref<2x8x32xf32, #tpu.memory_space<vmem>>, %arg16: memref<64x32xf32, #tpu.memory_space<vmem>>) attributes {dimension_semantics = [], scalar_prefetch = 0 : i64, scratch_operands = 1 : i64, tpu.core_type = #tpu.core_type<tc>} {
    %c0 = arith.constant 0 : index
    %c0_0 = arith.constant 0 : index
    %c0_1 = arith.constant 0 : index
    %0 = vector.load %arg8[%c0, %c0_0, %c0_1] : memref<2x1x128xf32, #tpu.memory_space<vmem>>, vector<1x1x128xf32>
    %1 = vector.shape_cast %0 : vector<1x1x128xf32> to vector<1x128xf32>
    %c0_2 = arith.constant 0 : index
    %c0_3 = arith.constant 0 : index
    %2 = vector.load %arg0[%c0_2, %c0_3] : memref<64x8xf32, #tpu.memory_space<vmem>>, vector<64x8xf32>
    %c0_4 = arith.constant 0 : index
    %c0_5 = arith.constant 0 : index
    %3 = vector.load %arg3[%c0_4, %c0_5] : memref<8x128xf32, #tpu.memory_space<vmem>>, vector<8x128xf32>
    %cst = arith.constant dense<0.000000e+00> : vector<64x128xf32>
    %4 = tpu.matmul %2, %3, %cst {dimension_numbers = #tpu.dot_dimension_numbers<[1], [0], [0], [1], [0, 0, 1, 1], [], []>} : vector<64x8xf32>, vector<8x128xf32>, vector<64x128xf32> -> vector<64x128xf32>
    %c0_6 = arith.constant 0 : index
    %c0_7 = arith.constant 0 : index
    %5 = vector.load %arg1[%c0_6, %c0_7] : memref<64x4xf32, #tpu.memory_space<vmem>>, vector<64x4xf32>
    %c0_8 = arith.constant 0 : index
    %c0_9 = arith.constant 0 : index
    %6 = vector.load %arg4[%c0_8, %c0_9] : memref<4x128xf32, #tpu.memory_space<vmem>>, vector<4x128xf32>
    %cst_10 = arith.constant dense<0.000000e+00> : vector<64x128xf32>
    %7 = tpu.matmul %5, %6, %cst_10 {dimension_numbers = #tpu.dot_dimension_numbers<[1], [0], [0], [1], [0, 0, 1, 1], [], []>} : vector<64x4xf32>, vector<4x128xf32>, vector<64x128xf32> -> vector<64x128xf32>
    %8 = arith.addf %4, %7 : vector<64x128xf32>
    %c0_11 = arith.constant 0 : index
    %c0_12 = arith.constant 0 : index
    %9 = vector.load %arg2[%c0_11, %c0_12] : memref<64x4xf32, #tpu.memory_space<vmem>>, vector<64x4xf32>
    %c0_13 = arith.constant 0 : index
    %c0_14 = arith.constant 0 : index
    %10 = vector.load %arg5[%c0_13, %c0_14] : memref<4x128xf32, #tpu.memory_space<vmem>>, vector<4x128xf32>
    %cst_15 = arith.constant dense<0.000000e+00> : vector<64x128xf32>
    %11 = tpu.matmul %9, %10, %cst_15 {dimension_numbers = #tpu.dot_dimension_numbers<[1], [0], [0], [1], [0, 0, 1, 1], [], []>} : vector<64x4xf32>, vector<4x128xf32>, vector<64x128xf32> -> vector<64x128xf32>
    %12 = arith.addf %8, %11 : vector<64x128xf32>
    %13 = vector.broadcast %1 : vector<1x128xf32> to vector<64x128xf32>
    %14 = arith.addf %12, %13 : vector<64x128xf32>
    %c0_16 = arith.constant 0 : index
    %c0_17 = arith.constant 0 : index
    %c0_18 = arith.constant 0 : index
    %15 = vector.load %arg7[%c0_16, %c0_17, %c0_18] : memref<2x32x128xf32, #tpu.memory_space<vmem>>, vector<1x32x128xf32>
    %16 = vector.shape_cast %15 : vector<1x32x128xf32> to vector<32x128xf32>
    %c0_19 = arith.constant 0 : index
    %c0_20 = arith.constant 0 : index
    %c0_21 = arith.constant 0 : index
    %17 = vector.load %arg9[%c0_19, %c0_20, %c0_21] : memref<2x8x32xf32, #tpu.memory_space<vmem>>, vector<1x8x32xf32>
    %18 = vector.shape_cast %17 : vector<1x8x32xf32> to vector<8x32xf32>
    %c0_22 = arith.constant 0 : index
    %c0_23 = arith.constant 0 : index
    %c0_24 = arith.constant 0 : index
    %19 = vector.load %arg10[%c0_22, %c0_23, %c0_24] : memref<2x8x32xf32, #tpu.memory_space<vmem>>, vector<1x8x32xf32>
    %20 = vector.shape_cast %19 : vector<1x8x32xf32> to vector<8x32xf32>
    %21 = vector.extract_strided_slice %14 {offsets = [0, 0], sizes = [8, 128], strides = [1, 1]} : vector<64x128xf32> to vector<8x128xf32>
    %cst_25 = arith.constant dense<0.000000e+00> : vector<8x128xf32>
    %22 = tpu.matmul %18, %16, %cst_25 {dimension_numbers = #tpu.dot_dimension_numbers<[1], [0], [0], [1], [0, 0, 1, 1], [], []>} : vector<8x32xf32>, vector<32x128xf32>, vector<8x128xf32> -> vector<8x128xf32>
    %23 = arith.addf %21, %22 : vector<8x128xf32>
    %24 = arith.negf %23 : vector<8x128xf32>
    %25 = math.exp %24 : vector<8x128xf32>
    %cst_26 = arith.constant 1.000000e+00 : f32
    %26 = vector.broadcast %cst_26 : f32 to vector<8x128xf32>
    %27 = arith.addf %26, %25 : vector<8x128xf32>
    %28 = arith.divf %26, %27 : vector<8x128xf32>
    %29 = math.tanh %23 : vector<8x128xf32>
    %30 = vector.extract_strided_slice %28 {offsets = [0, 0], sizes = [8, 32], strides = [1, 1]} : vector<8x128xf32> to vector<8x32xf32>
    %31 = vector.extract_strided_slice %28 {offsets = [0, 32], sizes = [8, 32], strides = [1, 1]} : vector<8x128xf32> to vector<8x32xf32>
    %32 = vector.extract_strided_slice %29 {offsets = [0, 64], sizes = [8, 32], strides = [1, 1]} : vector<8x128xf32> to vector<8x32xf32>
    %33 = vector.extract_strided_slice %28 {offsets = [0, 96], sizes = [8, 32], strides = [1, 1]} : vector<8x128xf32> to vector<8x32xf32>
    %34 = arith.mulf %31, %20 : vector<8x32xf32>
    %35 = arith.mulf %30, %32 : vector<8x32xf32>
    %36 = arith.addf %34, %35 : vector<8x32xf32>
    %37 = math.tanh %36 : vector<8x32xf32>
    %38 = arith.mulf %33, %37 : vector<8x32xf32>
    %c0_27 = arith.constant 0 : index
    %c0_28 = arith.constant 0 : index
    %39 = vector.load %arg16[%c0_27, %c0_28] : memref<64x32xf32, #tpu.memory_space<vmem>>, vector<8x32xf32>
    tpu.vector_store %arg16[%c0_27, %c0_28], %38 {strides = array<i32>} : memref<64x32xf32, #tpu.memory_space<vmem>>, vector<8x32xf32>,
    %40 = vector.extract_strided_slice %14 {offsets = [8, 0], sizes = [8, 128], strides = [1, 1]} : vector<64x128xf32> to vector<8x128xf32>
    %cst_29 = arith.constant dense<0.000000e+00> : vector<8x128xf32>
    %41 = tpu.matmul %38, %16, %cst_29 {dimension_numbers = #tpu.dot_dimension_numbers<[1], [0], [0], [1], [0, 0, 1, 1], [], []>} : vector<8x32xf32>, vector<32x128xf32>, vector<8x128xf32> -> vector<8x128xf32>
    %42 = arith.addf %40, %41 : vector<8x128xf32>
    %43 = arith.negf %42 : vector<8x128xf32>
    %44 = math.exp %43 : vector<8x128xf32>
    %cst_30 = arith.constant 1.000000e+00 : f32
    %45 = vector.broadcast %cst_30 : f32 to vector<8x128xf32>
    %46 = arith.addf %45, %44 : vector<8x128xf32>
    %47 = arith.divf %45, %46 : vector<8x128xf32>
    %48 = math.tanh %42 : vector<8x128xf32>
    %49 = vector.extract_strided_slice %47 {offsets = [0, 0], sizes = [8, 32], strides = [1, 1]} : vector<8x128xf32> to vector<8x32xf32>
    %50 = vector.extract_strided_slice %47 {offsets = [0, 32], sizes = [8, 32], strides = [1, 1]} : vector<8x128xf32> to vector<8x32xf32>
    %51 = vector.extract_strided_slice %48 {offsets = [0, 64], sizes = [8, 32], strides = [1, 1]} : vector<8x128xf32> to vector<8x32xf32>
    %52 = vector.extract_strided_slice %47 {offsets = [0, 96], sizes = [8, 32], strides = [1, 1]} : vector<8x128xf32> to vector<8x32xf32>
    %53 = arith.mulf %50, %36 : vector<8x32xf32>
    %54 = arith.mulf %49, %51 : vector<8x32xf32>
    %55 = arith.addf %53, %54 : vector<8x32xf32>
    %56 = math.tanh %55 : vector<8x32xf32>
    %57 = arith.mulf %52, %56 : vector<8x32xf32>
    %c8 = arith.constant 8 : index
    %c0_31 = arith.constant 0 : index
    %58 = vector.load %arg16[%c8, %c0_31] : memref<64x32xf32, #tpu.memory_space<vmem>>, vector<8x32xf32>
    tpu.vector_store %arg16[%c8, %c0_31], %57 {strides = array<i32>} : memref<64x32xf32, #tpu.memory_space<vmem>>, vector<8x32xf32>,
    %59 = vector.extract_strided_slice %14 {offsets = [16, 0], sizes = [8, 128], strides = [1, 1]} : vector<64x128xf32> to vector<8x128xf32>
    %cst_32 = arith.constant dense<0.000000e+00> : vector<8x128xf32>
    %60 = tpu.matmul %57, %16, %cst_32 {dimension_numbers = #tpu.dot_dimension_numbers<[1], [0], [0], [1], [0, 0, 1, 1], [], []>} : vector<8x32xf32>, vector<32x128xf32>, vector<8x128xf32> -> vector<8x128xf32>
    %61 = arith.addf %59, %60 : vector<8x128xf32>
    %62 = arith.negf %61 : vector<8x128xf32>
    %63 = math.exp %62 : vector<8x128xf32>
    %cst_33 = arith.constant 1.000000e+00 : f32
    %64 = vector.broadcast %cst_33 : f32 to vector<8x128xf32>
    %65 = arith.addf %64, %63 : vector<8x128xf32>
    %66 = arith.divf %64, %65 : vector<8x128xf32>
    %67 = math.tanh %61 : vector<8x128xf32>
    %68 = vector.extract_strided_slice %66 {offsets = [0, 0], sizes = [8, 32], strides = [1, 1]} : vector<8x128xf32> to vector<8x32xf32>
    %69 = vector.extract_strided_slice %66 {offsets = [0, 32], sizes = [8, 32], strides = [1, 1]} : vector<8x128xf32> to vector<8x32xf32>
    %70 = vector.extract_strided_slice %67 {offsets = [0, 64], sizes = [8, 32], strides = [1, 1]} : vector<8x128xf32> to vector<8x32xf32>
    %71 = vector.extract_strided_slice %66 {offsets = [0, 96], sizes = [8, 32], strides = [1, 1]} : vector<8x128xf32> to vector<8x32xf32>
    %72 = arith.mulf %69, %55 : vector<8x32xf32>
    %73 = arith.mulf %68, %70 : vector<8x32xf32>
    %74 = arith.addf %72, %73 : vector<8x32xf32>
    %75 = math.tanh %74 : vector<8x32xf32>
    %76 = arith.mulf %71, %75 : vector<8x32xf32>
    %c16 = arith.constant 16 : index
    %c0_34 = arith.constant 0 : index
    %77 = vector.load %arg16[%c16, %c0_34] : memref<64x32xf32, #tpu.memory_space<vmem>>, vector<8x32xf32>
    tpu.vector_store %arg16[%c16, %c0_34], %76 {strides = array<i32>} : memref<64x32xf32, #tpu.memory_space<vmem>>, vector<8x32xf32>,
    %78 = vector.extract_strided_slice %14 {offsets = [24, 0], sizes = [8, 128], strides = [1, 1]} : vector<64x128xf32> to vector<8x128xf32>
    %cst_35 = arith.constant dense<0.000000e+00> : vector<8x128xf32>
    %79 = tpu.matmul %76, %16, %cst_35 {dimension_numbers = #tpu.dot_dimension_numbers<[1], [0], [0], [1], [0, 0, 1, 1], [], []>} : vector<8x32xf32>, vector<32x128xf32>, vector<8x128xf32> -> vector<8x128xf32>
    %80 = arith.addf %78, %79 : vector<8x128xf32>
    %81 = arith.negf %80 : vector<8x128xf32>
    %82 = math.exp %81 : vector<8x128xf32>
    %cst_36 = arith.constant 1.000000e+00 : f32
    %83 = vector.broadcast %cst_36 : f32 to vector<8x128xf32>
    %84 = arith.addf %83, %82 : vector<8x128xf32>
    %85 = arith.divf %83, %84 : vector<8x128xf32>
    %86 = math.tanh %80 : vector<8x128xf32>
    %87 = vector.extract_strided_slice %85 {offsets = [0, 0], sizes = [8, 32], strides = [1, 1]} : vector<8x128xf32> to vector<8x32xf32>
    %88 = vector.extract_strided_slice %85 {offsets = [0, 32], sizes = [8, 32], strides = [1, 1]} : vector<8x128xf32> to vector<8x32xf32>
    %89 = vector.extract_strided_slice %86 {offsets = [0, 64], sizes = [8, 32], strides = [1, 1]} : vector<8x128xf32> to vector<8x32xf32>
    %90 = vector.extract_strided_slice %85 {offsets = [0, 96], sizes = [8, 32], strides = [1, 1]} : vector<8x128xf32> to vector<8x32xf32>
    %91 = arith.mulf %88, %74 : vector<8x32xf32>
    %92 = arith.mulf %87, %89 : vector<8x32xf32>
    %93 = arith.addf %91, %92 : vector<8x32xf32>
    %94 = math.tanh %93 : vector<8x32xf32>
    %95 = arith.mulf %90, %94 : vector<8x32xf32>
    %c24 = arith.constant 24 : index
    %c0_37 = arith.constant 0 : index
    %96 = vector.load %arg16[%c24, %c0_37] : memref<64x32xf32, #tpu.memory_space<vmem>>, vector<8x32xf32>
    tpu.vector_store %arg16[%c24, %c0_37], %95 {strides = array<i32>} : memref<64x32xf32, #tpu.memory_space<vmem>>, vector<8x32xf32>,
    %97 = vector.extract_strided_slice %14 {offsets = [32, 0], sizes = [8, 128], strides = [1, 1]} : vector<64x128xf32> to vector<8x128xf32>
    %cst_38 = arith.constant dense<0.000000e+00> : vector<8x128xf32>
    %98 = tpu.matmul %95, %16, %cst_38 {dimension_numbers = #tpu.dot_dimension_numbers<[1], [0], [0], [1], [0, 0, 1, 1], [], []>} : vector<8x32xf32>, vector<32x128xf32>, vector<8x128xf32> -> vector<8x128xf32>
    %99 = arith.addf %97, %98 : vector<8x128xf32>
    %100 = arith.negf %99 : vector<8x128xf32>
    %101 = math.exp %100 : vector<8x128xf32>
    %cst_39 = arith.constant 1.000000e+00 : f32
    %102 = vector.broadcast %cst_39 : f32 to vector<8x128xf32>
    %103 = arith.addf %102, %101 : vector<8x128xf32>
    %104 = arith.divf %102, %103 : vector<8x128xf32>
    %105 = math.tanh %99 : vector<8x128xf32>
    %106 = vector.extract_strided_slice %104 {offsets = [0, 0], sizes = [8, 32], strides = [1, 1]} : vector<8x128xf32> to vector<8x32xf32>
    %107 = vector.extract_strided_slice %104 {offsets = [0, 32], sizes = [8, 32], strides = [1, 1]} : vector<8x128xf32> to vector<8x32xf32>
    %108 = vector.extract_strided_slice %105 {offsets = [0, 64], sizes = [8, 32], strides = [1, 1]} : vector<8x128xf32> to vector<8x32xf32>
    %109 = vector.extract_strided_slice %104 {offsets = [0, 96], sizes = [8, 32], strides = [1, 1]} : vector<8x128xf32> to vector<8x32xf32>
    %110 = arith.mulf %107, %93 : vector<8x32xf32>
    %111 = arith.mulf %106, %108 : vector<8x32xf32>
    %112 = arith.addf %110, %111 : vector<8x32xf32>
    %113 = math.tanh %112 : vector<8x32xf32>
    %114 = arith.mulf %109, %113 : vector<8x32xf32>
    %c32 = arith.constant 32 : index
    %c0_40 = arith.constant 0 : index
    %115 = vector.load %arg16[%c32, %c0_40] : memref<64x32xf32, #tpu.memory_space<vmem>>, vector<8x32xf32>
    tpu.vector_store %arg16[%c32, %c0_40], %114 {strides = array<i32>} : memref<64x32xf32, #tpu.memory_space<vmem>>, vector<8x32xf32>,
    %116 = vector.extract_strided_slice %14 {offsets = [40, 0], sizes = [8, 128], strides = [1, 1]} : vector<64x128xf32> to vector<8x128xf32>
    %cst_41 = arith.constant dense<0.000000e+00> : vector<8x128xf32>
    %117 = tpu.matmul %114, %16, %cst_41 {dimension_numbers = #tpu.dot_dimension_numbers<[1], [0], [0], [1], [0, 0, 1, 1], [], []>} : vector<8x32xf32>, vector<32x128xf32>, vector<8x128xf32> -> vector<8x128xf32>
    %118 = arith.addf %116, %117 : vector<8x128xf32>
    %119 = arith.negf %118 : vector<8x128xf32>
    %120 = math.exp %119 : vector<8x128xf32>
    %cst_42 = arith.constant 1.000000e+00 : f32
    %121 = vector.broadcast %cst_42 : f32 to vector<8x128xf32>
    %122 = arith.addf %121, %120 : vector<8x128xf32>
    %123 = arith.divf %121, %122 : vector<8x128xf32>
    %124 = math.tanh %118 : vector<8x128xf32>
    %125 = vector.extract_strided_slice %123 {offsets = [0, 0], sizes = [8, 32], strides = [1, 1]} : vector<8x128xf32> to vector<8x32xf32>
    %126 = vector.extract_strided_slice %123 {offsets = [0, 32], sizes = [8, 32], strides = [1, 1]} : vector<8x128xf32> to vector<8x32xf32>
    %127 = vector.extract_strided_slice %124 {offsets = [0, 64], sizes = [8, 32], strides = [1, 1]} : vector<8x128xf32> to vector<8x32xf32>
    %128 = vector.extract_strided_slice %123 {offsets = [0, 96], sizes = [8, 32], strides = [1, 1]} : vector<8x128xf32> to vector<8x32xf32>
    %129 = arith.mulf %126, %112 : vector<8x32xf32>
    %130 = arith.mulf %125, %127 : vector<8x32xf32>
    %131 = arith.addf %129, %130 : vector<8x32xf32>
    %132 = math.tanh %131 : vector<8x32xf32>
    %133 = arith.mulf %128, %132 : vector<8x32xf32>
    %c40 = arith.constant 40 : index
    %c0_43 = arith.constant 0 : index
    %134 = vector.load %arg16[%c40, %c0_43] : memref<64x32xf32, #tpu.memory_space<vmem>>, vector<8x32xf32>
    tpu.vector_store %arg16[%c40, %c0_43], %133 {strides = array<i32>} : memref<64x32xf32, #tpu.memory_space<vmem>>, vector<8x32xf32>,
    %135 = vector.extract_strided_slice %14 {offsets = [48, 0], sizes = [8, 128], strides = [1, 1]} : vector<64x128xf32> to vector<8x128xf32>
    %cst_44 = arith.constant dense<0.000000e+00> : vector<8x128xf32>
    %136 = tpu.matmul %133, %16, %cst_44 {dimension_numbers = #tpu.dot_dimension_numbers<[1], [0], [0], [1], [0, 0, 1, 1], [], []>} : vector<8x32xf32>, vector<32x128xf32>, vector<8x128xf32> -> vector<8x128xf32>
    %137 = arith.addf %135, %136 : vector<8x128xf32>
    %138 = arith.negf %137 : vector<8x128xf32>
    %139 = math.exp %138 : vector<8x128xf32>
    %cst_45 = arith.constant 1.000000e+00 : f32
    %140 = vector.broadcast %cst_45 : f32 to vector<8x128xf32>
    %141 = arith.addf %140, %139 : vector<8x128xf32>
    %142 = arith.divf %140, %141 : vector<8x128xf32>
    %143 = math.tanh %137 : vector<8x128xf32>
    %144 = vector.extract_strided_slice %142 {offsets = [0, 0], sizes = [8, 32], strides = [1, 1]} : vector<8x128xf32> to vector<8x32xf32>
    %145 = vector.extract_strided_slice %142 {offsets = [0, 32], sizes = [8, 32], strides = [1, 1]} : vector<8x128xf32> to vector<8x32xf32>
    %146 = vector.extract_strided_slice %143 {offsets = [0, 64], sizes = [8, 32], strides = [1, 1]} : vector<8x128xf32> to vector<8x32xf32>
    %147 = vector.extract_strided_slice %142 {offsets = [0, 96], sizes = [8, 32], strides = [1, 1]} : vector<8x128xf32> to vector<8x32xf32>
    %148 = arith.mulf %145, %131 : vector<8x32xf32>
    %149 = arith.mulf %144, %146 : vector<8x32xf32>
    %150 = arith.addf %148, %149 : vector<8x32xf32>
    %151 = math.tanh %150 : vector<8x32xf32>
    %152 = arith.mulf %147, %151 : vector<8x32xf32>
    %c48 = arith.constant 48 : index
    %c0_46 = arith.constant 0 : index
    %153 = vector.load %arg16[%c48, %c0_46] : memref<64x32xf32, #tpu.memory_space<vmem>>, vector<8x32xf32>
    tpu.vector_store %arg16[%c48, %c0_46], %152 {strides = array<i32>} : memref<64x32xf32, #tpu.memory_space<vmem>>, vector<8x32xf32>,
    %154 = vector.extract_strided_slice %14 {offsets = [56, 0], sizes = [8, 128], strides = [1, 1]} : vector<64x128xf32> to vector<8x128xf32>
    %cst_47 = arith.constant dense<0.000000e+00> : vector<8x128xf32>
    %155 = tpu.matmul %152, %16, %cst_47 {dimension_numbers = #tpu.dot_dimension_numbers<[1], [0], [0], [1], [0, 0, 1, 1], [], []>} : vector<8x32xf32>, vector<32x128xf32>, vector<8x128xf32> -> vector<8x128xf32>
    %156 = arith.addf %154, %155 : vector<8x128xf32>
    %157 = arith.negf %156 : vector<8x128xf32>
    %158 = math.exp %157 : vector<8x128xf32>
    %cst_48 = arith.constant 1.000000e+00 : f32
    %159 = vector.broadcast %cst_48 : f32 to vector<8x128xf32>
    %160 = arith.addf %159, %158 : vector<8x128xf32>
    %161 = arith.divf %159, %160 : vector<8x128xf32>
    %162 = math.tanh %156 : vector<8x128xf32>
    %163 = vector.extract_strided_slice %161 {offsets = [0, 0], sizes = [8, 32], strides = [1, 1]} : vector<8x128xf32> to vector<8x32xf32>
    %164 = vector.extract_strided_slice %161 {offsets = [0, 32], sizes = [8, 32], strides = [1, 1]} : vector<8x128xf32> to vector<8x32xf32>
    %165 = vector.extract_strided_slice %162 {offsets = [0, 64], sizes = [8, 32], strides = [1, 1]} : vector<8x128xf32> to vector<8x32xf32>
    %166 = vector.extract_strided_slice %161 {offsets = [0, 96], sizes = [8, 32], strides = [1, 1]} : vector<8x128xf32> to vector<8x32xf32>
    %167 = arith.mulf %164, %150 : vector<8x32xf32>
    %168 = arith.mulf %163, %165 : vector<8x32xf32>
    %169 = arith.addf %167, %168 : vector<8x32xf32>
    %170 = math.tanh %169 : vector<8x32xf32>
    %171 = arith.mulf %166, %170 : vector<8x32xf32>
    %c56 = arith.constant 56 : index
    %c0_49 = arith.constant 0 : index
    %172 = vector.load %arg16[%c56, %c0_49] : memref<64x32xf32, #tpu.memory_space<vmem>>, vector<8x32xf32>
    tpu.vector_store %arg16[%c56, %c0_49], %171 {strides = array<i32>} : memref<64x32xf32, #tpu.memory_space<vmem>>, vector<8x32xf32>,
    %c0_50 = arith.constant 0 : index
    %c0_51 = arith.constant 0 : index
    %c0_52 = arith.constant 0 : index
    %173 = vector.load %arg14[%c0_50, %c0_51, %c0_52] : memref<2x8x32xf32, #tpu.memory_space<vmem>>, vector<1x8x32xf32>
    %174 = vector.shape_cast %173 : vector<1x8x32xf32> to vector<8x32xf32>
    %175 = vector.shape_cast %171 : vector<8x32xf32> to vector<1x8x32xf32>
    tpu.vector_store %arg14[%c0_50, %c0_51, %c0_52], %175 {strides = array<i32>} : memref<2x8x32xf32, #tpu.memory_space<vmem>>, vector<1x8x32xf32>,
    %c0_53 = arith.constant 0 : index
    %c0_54 = arith.constant 0 : index
    %c0_55 = arith.constant 0 : index
    %176 = vector.load %arg15[%c0_53, %c0_54, %c0_55] : memref<2x8x32xf32, #tpu.memory_space<vmem>>, vector<1x8x32xf32>
    %177 = vector.shape_cast %176 : vector<1x8x32xf32> to vector<8x32xf32>
    %178 = vector.shape_cast %169 : vector<8x32xf32> to vector<1x8x32xf32>
    tpu.vector_store %arg15[%c0_53, %c0_54, %c0_55], %178 {strides = array<i32>} : memref<2x8x32xf32, #tpu.memory_space<vmem>>, vector<1x8x32xf32>,
    %c0_56 = arith.constant 0 : index
    %c0_57 = arith.constant 0 : index
    %179 = vector.load %arg11[%c0_56, %c0_57] : memref<64x128xf32, #tpu.memory_space<vmem>>, vector<32x128xf32>
    %cst_58 = arith.constant dense<0.000000e+00> : vector<8x128xf32>
    %180 = tpu.matmul %171, %179, %cst_58 {dimension_numbers = #tpu.dot_dimension_numbers<[1], [0], [0], [1], [0, 0, 1, 1], [], []>} : vector<8x32xf32>, vector<32x128xf32>, vector<8x128xf32> -> vector<8x128xf32>
    %c1 = arith.constant 1 : index
    %c0_59 = arith.constant 0 : index
    %c0_60 = arith.constant 0 : index
    %181 = vector.load %arg8[%c1, %c0_59, %c0_60] : memref<2x1x128xf32, #tpu.memory_space<vmem>>, vector<1x1x128xf32>
    %182 = vector.shape_cast %181 : vector<1x1x128xf32> to vector<1x128xf32>
    %c0_61 = arith.constant 0 : index
    %c0_62 = arith.constant 0 : index
    %183 = vector.load %arg16[%c0_61, %c0_62] : memref<64x32xf32, #tpu.memory_space<vmem>>, vector<64x32xf32>
    %c0_63 = arith.constant 0 : index
    %c0_64 = arith.constant 0 : index
    %c0_65 = arith.constant 0 : index
    %184 = vector.load %arg6[%c0_63, %c0_64, %c0_65] : memref<1x32x128xf32, #tpu.memory_space<vmem>>, vector<1x32x128xf32>
    %185 = vector.shape_cast %184 : vector<1x32x128xf32> to vector<32x128xf32>
    %cst_66 = arith.constant dense<0.000000e+00> : vector<64x128xf32>
    %186 = tpu.matmul %183, %185, %cst_66 {dimension_numbers = #tpu.dot_dimension_numbers<[1], [0], [0], [1], [0, 0, 1, 1], [], []>} : vector<64x32xf32>, vector<32x128xf32>, vector<64x128xf32> -> vector<64x128xf32>
    %187 = vector.broadcast %182 : vector<1x128xf32> to vector<64x128xf32>
    %188 = arith.addf %186, %187 : vector<64x128xf32>
    %c1_67 = arith.constant 1 : index
    %c0_68 = arith.constant 0 : index
    %c0_69 = arith.constant 0 : index
    %189 = vector.load %arg7[%c1_67, %c0_68, %c0_69] : memref<2x32x128xf32, #tpu.memory_space<vmem>>, vector<1x32x128xf32>
    %190 = vector.shape_cast %189 : vector<1x32x128xf32> to vector<32x128xf32>
    %c1_70 = arith.constant 1 : index
    %c0_71 = arith.constant 0 : index
    %c0_72 = arith.constant 0 : index
    %191 = vector.load %arg9[%c1_70, %c0_71, %c0_72] : memref<2x8x32xf32, #tpu.memory_space<vmem>>, vector<1x8x32xf32>
    %192 = vector.shape_cast %191 : vector<1x8x32xf32> to vector<8x32xf32>
    %c1_73 = arith.constant 1 : index
    %c0_74 = arith.constant 0 : index
    %c0_75 = arith.constant 0 : index
    %193 = vector.load %arg10[%c1_73, %c0_74, %c0_75] : memref<2x8x32xf32, #tpu.memory_space<vmem>>, vector<1x8x32xf32>
    %194 = vector.shape_cast %193 : vector<1x8x32xf32> to vector<8x32xf32>
    %195 = vector.extract_strided_slice %188 {offsets = [0, 0], sizes = [8, 128], strides = [1, 1]} : vector<64x128xf32> to vector<8x128xf32>
    %cst_76 = arith.constant dense<0.000000e+00> : vector<8x128xf32>
    %196 = tpu.matmul %192, %190, %cst_76 {dimension_numbers = #tpu.dot_dimension_numbers<[1], [0], [0], [1], [0, 0, 1, 1], [], []>} : vector<8x32xf32>, vector<32x128xf32>, vector<8x128xf32> -> vector<8x128xf32>
    %197 = arith.addf %195, %196 : vector<8x128xf32>
    %198 = arith.negf %197 : vector<8x128xf32>
    %199 = math.exp %198 : vector<8x128xf32>
    %cst_77 = arith.constant 1.000000e+00 : f32
    %200 = vector.broadcast %cst_77 : f32 to vector<8x128xf32>
    %201 = arith.addf %200, %199 : vector<8x128xf32>
    %202 = arith.divf %200, %201 : vector<8x128xf32>
    %203 = math.tanh %197 : vector<8x128xf32>
    %204 = vector.extract_strided_slice %202 {offsets = [0, 0], sizes = [8, 32], strides = [1, 1]} : vector<8x128xf32> to vector<8x32xf32>
    %205 = vector.extract_strided_slice %202 {offsets = [0, 32], sizes = [8, 32], strides = [1, 1]} : vector<8x128xf32> to vector<8x32xf32>
    %206 = vector.extract_strided_slice %203 {offsets = [0, 64], sizes = [8, 32], strides = [1, 1]} : vector<8x128xf32> to vector<8x32xf32>
    %207 = vector.extract_strided_slice %202 {offsets = [0, 96], sizes = [8, 32], strides = [1, 1]} : vector<8x128xf32> to vector<8x32xf32>
    %208 = arith.mulf %205, %194 : vector<8x32xf32>
    %209 = arith.mulf %204, %206 : vector<8x32xf32>
    %210 = arith.addf %208, %209 : vector<8x32xf32>
    %211 = math.tanh %210 : vector<8x32xf32>
    %212 = arith.mulf %207, %211 : vector<8x32xf32>
    %213 = vector.extract_strided_slice %188 {offsets = [8, 0], sizes = [8, 128], strides = [1, 1]} : vector<64x128xf32> to vector<8x128xf32>
    %cst_78 = arith.constant dense<0.000000e+00> : vector<8x128xf32>
    %214 = tpu.matmul %212, %190, %cst_78 {dimension_numbers = #tpu.dot_dimension_numbers<[1], [0], [0], [1], [0, 0, 1, 1], [], []>} : vector<8x32xf32>, vector<32x128xf32>, vector<8x128xf32> -> vector<8x128xf32>
    %215 = arith.addf %213, %214 : vector<8x128xf32>
    %216 = arith.negf %215 : vector<8x128xf32>
    %217 = math.exp %216 : vector<8x128xf32>
    %cst_79 = arith.constant 1.000000e+00 : f32
    %218 = vector.broadcast %cst_79 : f32 to vector<8x128xf32>
    %219 = arith.addf %218, %217 : vector<8x128xf32>
    %220 = arith.divf %218, %219 : vector<8x128xf32>
    %221 = math.tanh %215 : vector<8x128xf32>
    %222 = vector.extract_strided_slice %220 {offsets = [0, 0], sizes = [8, 32], strides = [1, 1]} : vector<8x128xf32> to vector<8x32xf32>
    %223 = vector.extract_strided_slice %220 {offsets = [0, 32], sizes = [8, 32], strides = [1, 1]} : vector<8x128xf32> to vector<8x32xf32>
    %224 = vector.extract_strided_slice %221 {offsets = [0, 64], sizes = [8, 32], strides = [1, 1]} : vector<8x128xf32> to vector<8x32xf32>
    %225 = vector.extract_strided_slice %220 {offsets = [0, 96], sizes = [8, 32], strides = [1, 1]} : vector<8x128xf32> to vector<8x32xf32>
    %226 = arith.mulf %223, %210 : vector<8x32xf32>
    %227 = arith.mulf %222, %224 : vector<8x32xf32>
    %228 = arith.addf %226, %227 : vector<8x32xf32>
    %229 = math.tanh %228 : vector<8x32xf32>
    %230 = arith.mulf %225, %229 : vector<8x32xf32>
    %231 = vector.extract_strided_slice %188 {offsets = [16, 0], sizes = [8, 128], strides = [1, 1]} : vector<64x128xf32> to vector<8x128xf32>
    %cst_80 = arith.constant dense<0.000000e+00> : vector<8x128xf32>
    %232 = tpu.matmul %230, %190, %cst_80 {dimension_numbers = #tpu.dot_dimension_numbers<[1], [0], [0], [1], [0, 0, 1, 1], [], []>} : vector<8x32xf32>, vector<32x128xf32>, vector<8x128xf32> -> vector<8x128xf32>
    %233 = arith.addf %231, %232 : vector<8x128xf32>
    %234 = arith.negf %233 : vector<8x128xf32>
    %235 = math.exp %234 : vector<8x128xf32>
    %cst_81 = arith.constant 1.000000e+00 : f32
    %236 = vector.broadcast %cst_81 : f32 to vector<8x128xf32>
    %237 = arith.addf %236, %235 : vector<8x128xf32>
    %238 = arith.divf %236, %237 : vector<8x128xf32>
    %239 = math.tanh %233 : vector<8x128xf32>
    %240 = vector.extract_strided_slice %238 {offsets = [0, 0], sizes = [8, 32], strides = [1, 1]} : vector<8x128xf32> to vector<8x32xf32>
    %241 = vector.extract_strided_slice %238 {offsets = [0, 32], sizes = [8, 32], strides = [1, 1]} : vector<8x128xf32> to vector<8x32xf32>
    %242 = vector.extract_strided_slice %239 {offsets = [0, 64], sizes = [8, 32], strides = [1, 1]} : vector<8x128xf32> to vector<8x32xf32>
    %243 = vector.extract_strided_slice %238 {offsets = [0, 96], sizes = [8, 32], strides = [1, 1]} : vector<8x128xf32> to vector<8x32xf32>
    %244 = arith.mulf %241, %228 : vector<8x32xf32>
    %245 = arith.mulf %240, %242 : vector<8x32xf32>
    %246 = arith.addf %244, %245 : vector<8x32xf32>
    %247 = math.tanh %246 : vector<8x32xf32>
    %248 = arith.mulf %243, %247 : vector<8x32xf32>
    %249 = vector.extract_strided_slice %188 {offsets = [24, 0], sizes = [8, 128], strides = [1, 1]} : vector<64x128xf32> to vector<8x128xf32>
    %cst_82 = arith.constant dense<0.000000e+00> : vector<8x128xf32>
    %250 = tpu.matmul %248, %190, %cst_82 {dimension_numbers = #tpu.dot_dimension_numbers<[1], [0], [0], [1], [0, 0, 1, 1], [], []>} : vector<8x32xf32>, vector<32x128xf32>, vector<8x128xf32> -> vector<8x128xf32>
    %251 = arith.addf %249, %250 : vector<8x128xf32>
    %252 = arith.negf %251 : vector<8x128xf32>
    %253 = math.exp %252 : vector<8x128xf32>
    %cst_83 = arith.constant 1.000000e+00 : f32
    %254 = vector.broadcast %cst_83 : f32 to vector<8x128xf32>
    %255 = arith.addf %254, %253 : vector<8x128xf32>
    %256 = arith.divf %254, %255 : vector<8x128xf32>
    %257 = math.tanh %251 : vector<8x128xf32>
    %258 = vector.extract_strided_slice %256 {offsets = [0, 0], sizes = [8, 32], strides = [1, 1]} : vector<8x128xf32> to vector<8x32xf32>
    %259 = vector.extract_strided_slice %256 {offsets = [0, 32], sizes = [8, 32], strides = [1, 1]} : vector<8x128xf32> to vector<8x32xf32>
    %260 = vector.extract_strided_slice %257 {offsets = [0, 64], sizes = [8, 32], strides = [1, 1]} : vector<8x128xf32> to vector<8x32xf32>
    %261 = vector.extract_strided_slice %256 {offsets = [0, 96], sizes = [8, 32], strides = [1, 1]} : vector<8x128xf32> to vector<8x32xf32>
    %262 = arith.mulf %259, %246 : vector<8x32xf32>
    %263 = arith.mulf %258, %260 : vector<8x32xf32>
    %264 = arith.addf %262, %263 : vector<8x32xf32>
    %265 = math.tanh %264 : vector<8x32xf32>
    %266 = arith.mulf %261, %265 : vector<8x32xf32>
    %267 = vector.extract_strided_slice %188 {offsets = [32, 0], sizes = [8, 128], strides = [1, 1]} : vector<64x128xf32> to vector<8x128xf32>
    %cst_84 = arith.constant dense<0.000000e+00> : vector<8x128xf32>
    %268 = tpu.matmul %266, %190, %cst_84 {dimension_numbers = #tpu.dot_dimension_numbers<[1], [0], [0], [1], [0, 0, 1, 1], [], []>} : vector<8x32xf32>, vector<32x128xf32>, vector<8x128xf32> -> vector<8x128xf32>
    %269 = arith.addf %267, %268 : vector<8x128xf32>
    %270 = arith.negf %269 : vector<8x128xf32>
    %271 = math.exp %270 : vector<8x128xf32>
    %cst_85 = arith.constant 1.000000e+00 : f32
    %272 = vector.broadcast %cst_85 : f32 to vector<8x128xf32>
    %273 = arith.addf %272, %271 : vector<8x128xf32>
    %274 = arith.divf %272, %273 : vector<8x128xf32>
    %275 = math.tanh %269 : vector<8x128xf32>
    %276 = vector.extract_strided_slice %274 {offsets = [0, 0], sizes = [8, 32], strides = [1, 1]} : vector<8x128xf32> to vector<8x32xf32>
    %277 = vector.extract_strided_slice %274 {offsets = [0, 32], sizes = [8, 32], strides = [1, 1]} : vector<8x128xf32> to vector<8x32xf32>
    %278 = vector.extract_strided_slice %275 {offsets = [0, 64], sizes = [8, 32], strides = [1, 1]} : vector<8x128xf32> to vector<8x32xf32>
    %279 = vector.extract_strided_slice %274 {offsets = [0, 96], sizes = [8, 32], strides = [1, 1]} : vector<8x128xf32> to vector<8x32xf32>
    %280 = arith.mulf %277, %264 : vector<8x32xf32>
    %281 = arith.mulf %276, %278 : vector<8x32xf32>
    %282 = arith.addf %280, %281 : vector<8x32xf32>
    %283 = math.tanh %282 : vector<8x32xf32>
    %284 = arith.mulf %279, %283 : vector<8x32xf32>
    %285 = vector.extract_strided_slice %188 {offsets = [40, 0], sizes = [8, 128], strides = [1, 1]} : vector<64x128xf32> to vector<8x128xf32>
    %cst_86 = arith.constant dense<0.000000e+00> : vector<8x128xf32>
    %286 = tpu.matmul %284, %190, %cst_86 {dimension_numbers = #tpu.dot_dimension_numbers<[1], [0], [0], [1], [0, 0, 1, 1], [], []>} : vector<8x32xf32>, vector<32x128xf32>, vector<8x128xf32> -> vector<8x128xf32>
    %287 = arith.addf %285, %286 : vector<8x128xf32>
    %288 = arith.negf %287 : vector<8x128xf32>
    %289 = math.exp %288 : vector<8x128xf32>
    %cst_87 = arith.constant 1.000000e+00 : f32
    %290 = vector.broadcast %cst_87 : f32 to vector<8x128xf32>
    %291 = arith.addf %290, %289 : vector<8x128xf32>
    %292 = arith.divf %290, %291 : vector<8x128xf32>
    %293 = math.tanh %287 : vector<8x128xf32>
    %294 = vector.extract_strided_slice %292 {offsets = [0, 0], sizes = [8, 32], strides = [1, 1]} : vector<8x128xf32> to vector<8x32xf32>
    %295 = vector.extract_strided_slice %292 {offsets = [0, 32], sizes = [8, 32], strides = [1, 1]} : vector<8x128xf32> to vector<8x32xf32>
    %296 = vector.extract_strided_slice %293 {offsets = [0, 64], sizes = [8, 32], strides = [1, 1]} : vector<8x128xf32> to vector<8x32xf32>
    %297 = vector.extract_strided_slice %292 {offsets = [0, 96], sizes = [8, 32], strides = [1, 1]} : vector<8x128xf32> to vector<8x32xf32>
    %298 = arith.mulf %295, %282 : vector<8x32xf32>
    %299 = arith.mulf %294, %296 : vector<8x32xf32>
    %300 = arith.addf %298, %299 : vector<8x32xf32>
    %301 = math.tanh %300 : vector<8x32xf32>
    %302 = arith.mulf %297, %301 : vector<8x32xf32>
    %303 = vector.extract_strided_slice %188 {offsets = [48, 0], sizes = [8, 128], strides = [1, 1]} : vector<64x128xf32> to vector<8x128xf32>
    %cst_88 = arith.constant dense<0.000000e+00> : vector<8x128xf32>
    %304 = tpu.matmul %302, %190, %cst_88 {dimension_numbers = #tpu.dot_dimension_numbers<[1], [0], [0], [1], [0, 0, 1, 1], [], []>} : vector<8x32xf32>, vector<32x128xf32>, vector<8x128xf32> -> vector<8x128xf32>
    %305 = arith.addf %303, %304 : vector<8x128xf32>
    %306 = arith.negf %305 : vector<8x128xf32>
    %307 = math.exp %306 : vector<8x128xf32>
    %cst_89 = arith.constant 1.000000e+00 : f32
    %308 = vector.broadcast %cst_89 : f32 to vector<8x128xf32>
    %309 = arith.addf %308, %307 : vector<8x128xf32>
    %310 = arith.divf %308, %309 : vector<8x128xf32>
    %311 = math.tanh %305 : vector<8x128xf32>
    %312 = vector.extract_strided_slice %310 {offsets = [0, 0], sizes = [8, 32], strides = [1, 1]} : vector<8x128xf32> to vector<8x32xf32>
    %313 = vector.extract_strided_slice %310 {offsets = [0, 32], sizes = [8, 32], strides = [1, 1]} : vector<8x128xf32> to vector<8x32xf32>
    %314 = vector.extract_strided_slice %311 {offsets = [0, 64], sizes = [8, 32], strides = [1, 1]} : vector<8x128xf32> to vector<8x32xf32>
    %315 = vector.extract_strided_slice %310 {offsets = [0, 96], sizes = [8, 32], strides = [1, 1]} : vector<8x128xf32> to vector<8x32xf32>
    %316 = arith.mulf %313, %300 : vector<8x32xf32>
    %317 = arith.mulf %312, %314 : vector<8x32xf32>
    %318 = arith.addf %316, %317 : vector<8x32xf32>
    %319 = math.tanh %318 : vector<8x32xf32>
    %320 = arith.mulf %315, %319 : vector<8x32xf32>
    %321 = vector.extract_strided_slice %188 {offsets = [56, 0], sizes = [8, 128], strides = [1, 1]} : vector<64x128xf32> to vector<8x128xf32>
    %cst_90 = arith.constant dense<0.000000e+00> : vector<8x128xf32>
    %322 = tpu.matmul %320, %190, %cst_90 {dimension_numbers = #tpu.dot_dimension_numbers<[1], [0], [0], [1], [0, 0, 1, 1], [], []>} : vector<8x32xf32>, vector<32x128xf32>, vector<8x128xf32> -> vector<8x128xf32>
    %323 = arith.addf %321, %322 : vector<8x128xf32>
    %324 = arith.negf %323 : vector<8x128xf32>
    %325 = math.exp %324 : vector<8x128xf32>
    %cst_91 = arith.constant 1.000000e+00 : f32
    %326 = vector.broadcast %cst_91 : f32 to vector<8x128xf32>
    %327 = arith.addf %326, %325 : vector<8x128xf32>
    %328 = arith.divf %326, %327 : vector<8x128xf32>
    %329 = math.tanh %323 : vector<8x128xf32>
    %330 = vector.extract_strided_slice %328 {offsets = [0, 0], sizes = [8, 32], strides = [1, 1]} : vector<8x128xf32> to vector<8x32xf32>
    %331 = vector.extract_strided_slice %328 {offsets = [0, 32], sizes = [8, 32], strides = [1, 1]} : vector<8x128xf32> to vector<8x32xf32>
    %332 = vector.extract_strided_slice %329 {offsets = [0, 64], sizes = [8, 32], strides = [1, 1]} : vector<8x128xf32> to vector<8x32xf32>
    %333 = vector.extract_strided_slice %328 {offsets = [0, 96], sizes = [8, 32], strides = [1, 1]} : vector<8x128xf32> to vector<8x32xf32>
    %334 = arith.mulf %331, %318 : vector<8x32xf32>
    %335 = arith.mulf %330, %332 : vector<8x32xf32>
    %336 = arith.addf %334, %335 : vector<8x32xf32>
    %337 = math.tanh %336 : vector<8x32xf32>
    %338 = arith.mulf %333, %337 : vector<8x32xf32>
    %c1_92 = arith.constant 1 : index
    %c0_93 = arith.constant 0 : index
    %c0_94 = arith.constant 0 : index
    %339 = vector.load %arg14[%c1_92, %c0_93, %c0_94] : memref<2x8x32xf32, #tpu.memory_space<vmem>>, vector<1x8x32xf32>
    %340 = vector.shape_cast %339 : vector<1x8x32xf32> to vector<8x32xf32>
    %341 = vector.shape_cast %338 : vector<8x32xf32> to vector<1x8x32xf32>
    tpu.vector_store %arg14[%c1_92, %c0_93, %c0_94], %341 {strides = array<i32>} : memref<2x8x32xf32, #tpu.memory_space<vmem>>, vector<1x8x32xf32>,
    %c1_95 = arith.constant 1 : index
    %c0_96 = arith.constant 0 : index
    %c0_97 = arith.constant 0 : index
    %342 = vector.load %arg15[%c1_95, %c0_96, %c0_97] : memref<2x8x32xf32, #tpu.memory_space<vmem>>, vector<1x8x32xf32>
    %343 = vector.shape_cast %342 : vector<1x8x32xf32> to vector<8x32xf32>
    %344 = vector.shape_cast %336 : vector<8x32xf32> to vector<1x8x32xf32>
    tpu.vector_store %arg15[%c1_95, %c0_96, %c0_97], %344 {strides = array<i32>} : memref<2x8x32xf32, #tpu.memory_space<vmem>>, vector<1x8x32xf32>,
    %c32_98 = arith.constant 32 : index
    %c0_99 = arith.constant 0 : index
    %345 = vector.load %arg11[%c32_98, %c0_99] : memref<64x128xf32, #tpu.memory_space<vmem>>, vector<32x128xf32>
    %cst_100 = arith.constant dense<0.000000e+00> : vector<8x128xf32>
    %346 = tpu.matmul %338, %345, %cst_100 {dimension_numbers = #tpu.dot_dimension_numbers<[1], [0], [0], [1], [0, 0, 1, 1], [], []>} : vector<8x32xf32>, vector<32x128xf32>, vector<8x128xf32> -> vector<8x128xf32>
    %347 = arith.addf %180, %346 : vector<8x128xf32>
    %c0_101 = arith.constant 0 : index
    %c0_102 = arith.constant 0 : index
    %348 = vector.load %arg12[%c0_101, %c0_102] : memref<1x128xf32, #tpu.memory_space<vmem>>, vector<1x128xf32>
    %349 = vector.broadcast %348 : vector<1x128xf32> to vector<8x128xf32>
    %350 = arith.addf %347, %349 : vector<8x128xf32>
    %c0_103 = arith.constant 0 : index
    %c0_104 = arith.constant 0 : index
    %351 = vector.load %arg13[%c0_103, %c0_104] : memref<8x128xf32, #tpu.memory_space<vmem>>, vector<8x128xf32>
    tpu.vector_store %arg13[%c0_103, %c0_104], %350 {strides = array<i32>} : memref<8x128xf32, #tpu.memory_space<vmem>>, vector<8x128xf32>,
    return
  }
}

</mosaic_0001>

<bundles_post_ra>
// kernel: tpu_custom_call.1
= control target key start
LH: loop header
LB: loop body
LE: loop exit
PB: predicated region body
PF: predicated region fallthrough
CT: control target
= control target key end

     0   :  { %21 = vsyncpa [#allocation4], 0  ;;  %vm93_vm0 = vcmask 1043456   ;;  %vm68_vm1 = vcmask 31744   ;;  %v3315_v5 = vmov 0.0|0.0   ;;  %vm3316_vm2 = vmmov 0   ;;  %s3913_s0 = inlined_call_operand.vmem [shape: f32[64,8], index: 0, kind: input, shape index: {}]   ;;  %s3914_s1 = inlined_call_operand.vmem [shape: f32[64,4], index: 1, kind: input, shape index: {}]   ;;  %s3915_s2 = inlined_call_operand.vmem [shape: f32[64,4], index: 2, kind: input, shape index: {}]   ;;  %s3916_s3 = inlined_call_operand.vmem [shape: f32[8,128], index: 3, kind: input, shape index: {}]   ;;  %s3917_s4 = inlined_call_operand.vmem [shape: f32[4,128], index: 4, kind: input, shape index: {}]   ;;  %s3918_s5 = inlined_call_operand.vmem [shape: f32[4,128], index: 5, kind: input, shape index: {}]   ;;  %s3919_s6 = inlined_call_operand.vmem [shape: f32[1,32,128], index: 6, kind: input, shape index: {}]   ;;  %s3920_s7 = inlined_call_operand.vmem [shape: f32[2,32,128], index: 7, kind: input, shape index: {}]   ;;  %s3921_s8 = inlined_call_operand.vmem [shape: f32[2,1,128], index: 8, kind: input, shape index: {}]   ;;  %s3922_s9 = inlined_call_operand.vmem [shape: f32[2,8,32], index: 9, kind: input, shape index: {}]   ;;  %s3923_s10 = inlined_call_operand.vmem [shape: f32[2,8,32], index: 10, kind: input, shape index: {}]   ;;  %s3924_s11 = inlined_call_operand.vmem [shape: f32[64,128], index: 11, kind: input, shape index: {}]   ;;  %s3925_s12 = inlined_call_operand.vmem [shape: f32[1,128], index: 12, kind: input, shape index: {}]   ;;  %s3926_s13 = inlined_call_operand.hbm [shape: f32[8,128], index: 13, kind: output, shape index: {0}]   ;;  %s3927_s14 = inlined_call_operand.hbm [shape: f32[2,8,32], index: 14, kind: output, shape index: {1}]   ;;  %s3928_s15 = inlined_call_operand.hbm [shape: f32[2,8,32], index: 15, kind: output, shape index: {2}]  }
   0x1   :  { %v67_v0 = vld [vmem:[%s3917_s4] sm:$0xf]  ;;  %v60_v2 = vld [vmem:[%s3914_s1 + $0x8] sm:$0xff]  ;;  %v61_v4 = vld [vmem:[%s3914_s1 + $0x10] sm:$0xff]  ;;  %2974 = vmatprep.subr.bf16.mxu1 %v3315_v5  ;;  %v3317_v9 = vmov 0.0  }
   0x2   :  { %v59_v1 = vld [vmem:[%s3914_s1] sm:$0xff]  ;;  %2714 = vmatprep.subr.msk.mxu0 %vm93_vm0, %v67_v0  ;;  %v62_v6 = vld [vmem:[%s3914_s1 + $0x18] sm:$0xff]  ;;  %2764 = vmatprep.mubr.msk.f32.mxu1 %vm3316_vm2, %v3317_v9  ;;  %v496_v11 = vld [vmem:[%s3920_s7 + $0x8] sm:$0xff] }
   0x3   :  { %2716 = vmatprep.mubr.msk.f32.mxu0 %vm68_vm1, %v59_v1  ;;  %v58_v3 = vld [vmem:[%s3916_s3] sm:$0xff]  ;;  %2715 = vmatpush3.msk.msra.mxu0 %vm93_vm0, %v67_v0  ;;  %v497_v13 = vld [vmem:[%s3920_s7 + $0x10] sm:$0xff]  ;;  %v64_v14 = vld [vmem:[%s3914_s1 + $0x28] sm:$0xff] }
   0x4   :  { %2717 = vmatmul.mubr.msk.f32.vlgmr.msra.gmra.mrb[0].mxu0 %vm68_vm1, %v60_v2  ;;  %2728 = vmatprep.subr.mxu0 %v58_v3  ;;  %v340_v7 = vld [vmem:[%s3918_s5] sm:$0xf]  ;;  %v498_v15 = vld [vmem:[%s3920_s7 + $0x18] sm:$0xff]  ;;  %v65_v16 = vld [vmem:[%s3914_s1 + $0x30] sm:$0xff] }
   0x5   :  { %2729 = vmatpush3.msra.mxu0 %v58_v3  ;;  %2719 = vmatprep.mubr.msk.f32.mxu0 %vm68_vm1, %v61_v4  ;;  %v63_v8 = vld [vmem:[%s3914_s1 + $0x20] sm:$0xff]  ;;  %v3462_v17 = vpack.c.bf16 %v498_v15, %v497_v13 }
   0x6   :  { %2742 = vmatprep.subr.msk.mxu0 %vm93_vm0, %v340_v7  ;;  %v495_v10 = vld [vmem:[%s3920_s7] sm:$0xff] }
   0x7   :  { %v3446_v12 = vpack.c.bf16 %v496_v11, %v495_v10 }
   0x8   :  { %2720 = vmatmul.mubr.msk.f32.gmra.mrb[2].mxu0 %vm68_vm1, %v62_v6 }
   0x9   :  { %2722 = vmatprep.mubr.msk.f32.mxu0 %vm68_vm1, %v63_v8  ;;  %2976 = vmatpush3.bf16.msra.mxu1 %v3446_v12 }
   0xa   :  { %2977 = vmatprep.subr.bf16.mxu1 %v3315_v5 }
   0xc   :  { %2723 = vmatmul.mubr.msk.f32.gmra.mrb[4].mxu0 %vm68_vm1, %v64_v14 }
   0xd   :  { %22 = vsyncpa [#allocation6], 0  ;;  %2725 = vmatprep.mubr.msk.f32.mxu0 %vm68_vm1, %v65_v16  ;;  %v66_v18 = vld [vmem:[%s3914_s1 + $0x38] sm:$0xff]  ;;  %v50_v19 = vld [vmem:[%s3913_s0] sm:$0xff]  ;;  %vm202_vm3 = vcmask 64512   ;;  %2979 = vmatpush3.bf16.msra.mxu1 %v3462_v17  ;;  %vm501_vm4 = vcmask 261120  }
   0xe   :  { %v499_v20 = vld [vmem:[%s3922_s9] sm:$0xff]  ;;  %2980 = vmatprep.subr.bf16.mxu1 %v3315_v5  ;;  %v51_v21 = vld [vmem:[%s3913_s0 + $0x8] sm:$0xff]  ;;  %v52_v22 = vld [vmem:[%s3913_s0 + $0x10] sm:$0xff]  ;;  %s3319_s28 = smov 32   ;;  %s3320_s23 = smov 96  }
   0xf   :  { %v53_v23 = vld [vmem:[%s3913_s0 + $0x18] sm:$0xff]  ;;  %v54_v24 = vld [vmem:[%s3913_s0 + $0x20] sm:$0xff]  ;;  %v55_v25 = vld [vmem:[%s3913_s0 + $0x28] sm:$0xff] }
  0x10   :  { %2726 = vmatmul.mubr.msk.f32.gmra.mrb[6].mxu0 %vm68_vm1, %v66_v18  ;;  %2765 = vmatmul.mubr.msk.f32.vlgmr.msra.gmra.mrb[0].mxu1 %vm501_vm4, %v499_v20  ;;  %v56_v26 = vld [vmem:[%s3913_s0 + $0x30] sm:$0xff]  ;;  %v57_v27 = vld [vmem:[%s3913_s0 + $0x38] sm:$0xff]  ;;  %v332_v28 = vld [vmem:[%s3915_s2] sm:$0xff] }
  0x11   :  { %2730 = vmatprep.mubr.msk.f32.mxu0 %vm202_vm3, %v50_v19  ;;  %2982 = vmatpush3.bf16.msra.mxu1 %v3446_v12  ;;  %v333_v29 = vld [vmem:[%s3915_s2 + $0x8] sm:$0xff]  ;;  %v334_v30 = vld [vmem:[%s3915_s2 + $0x10] sm:$0xff]  ;;  %v335_v31 = vld [vmem:[%s3915_s2 + $0x18] sm:$0xff] }
  0x12   :  { %2775 = vmatprep.mubr.msk.f32.mxu1 %vm3316_vm2, %v3317_v9  ;;  %2983 = vmatprep.subr.bf16.mxu1 %v3315_v5  ;;  %v336_v32 = vld [vmem:[%s3915_s2 + $0x20] sm:$0xff]  ;;  %v337_v33 = vld [vmem:[%s3915_s2 + $0x28] sm:$0xff]  ;;  %v338_v34 = vld [vmem:[%s3915_s2 + $0x30] sm:$0xff] }
  0x13   :  { %v339_v35 = vld [vmem:[%s3915_s2 + $0x38] sm:$0xff]  ;;  %v2533_v38 = vld [vmem:[%s3921_s8] ss:$0 sm:$0xff]  ;;  %s3318_s2 = smov 64  }
  0x14   :  { %2731 = vmatmul.mubr.msk.f32.vlgmr.msra.gmra.mrb[0].mxu0 %vm202_vm3, %v51_v21  ;;  %v500_v57 = vld [vmem:[%s3923_s10] sm:$0xff] }
  0x15   :  { %2743 = vmatpush3.msk.msra.mxu0 %vm93_vm0, %v340_v7  ;;  %2733 = vmatprep.mubr.msk.f32.mxu0 %vm202_vm3, %v52_v22 }
  0x16   :  { %2985 = vmatpush3.bf16.msra.mxu1 %v3462_v17  ;;  %3010 = vmatprep.subr.bf16.mxu0 %v3315_v5 }
  0x17   :  { %2986 = vmatprep.subr.bf16.mxu1 %v3315_v5 }
  0x18   :  { %2734 = vmatmul.mubr.msk.f32.gmra.mrb[2].mxu0 %vm202_vm3, %v53_v23 }
  0x19   :  { %2736 = vmatprep.mubr.msk.f32.mxu0 %vm202_vm3, %v54_v24 }
  0x1c   :  { %2737 = vmatmul.mubr.msk.f32.gmra.mrb[4].mxu0 %vm202_vm3, %v55_v25 }
  0x1d   :  { %2739 = vmatprep.mubr.msk.f32.mxu0 %vm202_vm3, %v56_v26 }
  0x20   :  { %2740 = vmatmul.mubr.msk.f32.gmra.mrb[6].mxu0 %vm202_vm3, %v57_v27 }
  0x21   :  { %2744 = vmatprep.mubr.msk.f32.mxu0 %vm68_vm1, %v332_v28 }
  0x24   :  { %2745 = vmatmul.mubr.msk.f32.vlgmr.msra.gmra.mrb[0].mxu0 %vm68_vm1, %v333_v29 }
  0x25   :  { %2747 = vmatprep.mubr.msk.f32.mxu0 %vm68_vm1, %v334_v30  ;;  %3012 = vmatpush3.bf16.msra.mxu0 %v3446_v12 }
  0x26   :  { %3013 = vmatprep.subr.bf16.mxu0 %v3315_v5 }
  0x28   :  { %2748 = vmatmul.mubr.msk.f32.gmra.mrb[2].mxu0 %vm68_vm1, %v335_v31 }
  0x29   :  { %2750 = vmatprep.mubr.msk.f32.mxu0 %vm68_vm1, %v336_v32  ;;  %3015 = vmatpush3.bf16.msra.mxu0 %v3462_v17 }
  0x2c   :  { %2751 = vmatmul.mubr.msk.f32.gmra.mrb[4].mxu0 %vm68_vm1, %v337_v33 }
  0x2d   :  { %2753 = vmatprep.mubr.msk.f32.mxu0 %vm68_vm1, %v338_v34 }
  0x30   :  { %2754 = vmatmul.mubr.msk.f32.gmra.mrb[6].mxu0 %vm68_vm1, %v339_v35 }
  0x31   :  { %2830 = vmatprep.mubr.msk.f32.mxu0 %vm3316_vm2, %v3317_v9 }
  0xe3   :  { %v571_v36 = vpop.f32.mrb[0].mxu1 }
  0xe4   :  { %v2766_v37 = vpop.f32.mrb[1].mxu1 }
  0xf7   :  { %v2746_v39 = vpop.f32.mrb[0].mxu0 }
  0xf8   :  { %v488_v40 = vadd.f32 %v2746_v39, %v2533_v38  ;;  %v434_v41 = vpop.f32.mrb[1].mxu0 }
  0xf9   :  { %v487_v42 = vadd.f32 %v2533_v38, %v434_v41 }
  0xfb   :  { %v575_v43 = vadd.f32 %v571_v36, %v487_v42  ;;  %v2749_v44 = vpop.f32.mrb[2].mxu0 }
  0xfc   :  { %v3557_v45 = vadd.f32 %v2749_v44, %v2533_v38  ;;  %v444_v46 = vpop.f32.mrb[3].mxu0 }
  0xfd   :  { %3117 = vtanh.f32 %v575_v43  ;;  %v3559_v47 = vadd.f32 %v2533_v38, %v444_v46  ;;  %v2535_v58 = vmul.f32 -1.442695, %v575_v43 }
  0xff   :  { %v2752_v48 = vpop.f32.mrb[4].mxu0  ;;  %3119 = vpow2.f32 %v2535_v58 }
 0x100   :  { %v3561_v49 = vadd.f32 %v2752_v48, %v2533_v38  ;;  %v454_v50 = vpop.f32.mrb[5].mxu0 }
 0x101   :  { %v3563_v51 = vadd.f32 %v2533_v38, %v454_v50 }
 0x103   :  { %v2755_v52 = vpop.f32.mrb[6].mxu0 }
 0x104   :  { %v3565_v53 = vadd.f32 %v2755_v52, %v2533_v38  ;;  %v464_v54 = vpop.f32.mrb[7].mxu0 }
 0x105   :  { %v3567_v55 = vadd.f32 %v2533_v38, %v464_v54 }
 0x107   :  { %v3118_v56 = vpop.eup %3117 }
 0x108   :  { %589 = vrot.lane.b32.xlu0 %v3118_v56, %s3318_s2 }
 0x109   :  { %v3120_v59 = vpop.eup %3119 }
 0x10a   :  { %v579_v60 = vadd.f32 1.0, %v3120_v59 }
 0x10c   :  { %584 = vrot.lane.b32.xlu0 %v500_v57, %s3319_s28  ;;  %3121 = vrcp.f32 %v579_v60 }
 0x116   :  { %v3122_v61 = vpop.eup %3121 }
 0x17a   :  { %v590_v62 = vpop.permute.xlu0 %589 }
 0x17b   :  { %v592_v63 = vmul.f32 %v3122_v61, %v590_v62 }
 0x17d   :  { %594 = vrot.lane.b32.xlu1 %v592_v63, %s3319_s28 }
 0x17e   :  { %v585_v0 = vpop.permute.xlu0 %584 }
 0x17f   :  { %v587_v1 = vmul.f32 %v3122_v61, %v585_v0 }
 0x1ef   :  { %v595_v2 = vpop.permute.xlu1 %594 }
 0x1f0   :  { %v597_v3 = vadd.f32 %v595_v2, %v587_v1 }
 0x1f2   :  { %3123 = vtanh.f32 %v597_v3 }
 0x1fc   :  { %v3124_v4 = vpop.eup %3123 }
 0x1fd   :  { %600 = vrot.lane.b32.xlu1 %v3124_v4, %s3318_s2 }
 0x26f   :  { %v601_v6 = vpop.permute.xlu1 %600 }
 0x270   :  { %v603_v7 = vmul.f32 %v3122_v61, %v601_v6 }
 0x272   :  { %605 = vrot.lane.b32.xlu0 %v603_v7, %s3319_s28 }
 0x2e4   :  { %v606_v8 = vpop.permute.xlu0 %605 }
 0x2e5   :  { %608 = vst.msk [vmem:[#allocation2] sm:$0xff] %vm501_vm4, %v606_v8  ;;  %2776 = vmatmul.mubr.msk.f32.vlgmr.msra.gmra.mrb[2].mxu1 %vm501_vm4, %v606_v8 }
 0x2e6   :  { %2988 = vmatpush3.bf16.msra.mxu1 %v3446_v12  ;;  %2786 = vmatprep.mubr.msk.f32.mxu1 %vm3316_vm2, %v3317_v9 }
 0x2e7   :  { %2989 = vmatprep.subr.bf16.mxu1 %v3315_v5 }
 0x2ea   :  { %2991 = vmatpush3.bf16.msra.mxu1 %v3462_v17 }
 0x2eb   :  { %2992 = vmatprep.subr.bf16.mxu1 %v3315_v5 }
 0x3b8   :  { %v677_v10 = vpop.f32.mrb[2].mxu1 }
 0x3b9   :  { %v681_v11 = vadd.f32 %v677_v10, %v488_v40  ;;  %v2777_v13 = vpop.f32.mrb[3].mxu1 }
 0x3bb   :  { %3125 = vtanh.f32 %v681_v11  ;;  %v2537_v15 = vmul.f32 -1.442695, %v681_v11 }
 0x3bd   :  { %3127 = vpow2.f32 %v2537_v15 }
 0x3c5   :  { %v3126_v14 = vpop.eup %3125 }
 0x3c6   :  { %691 = vrot.lane.b32.xlu1 %v3126_v14, %s3318_s2 }
 0x3c7   :  { %v3128_v16 = vpop.eup %3127 }
 0x3c8   :  { %v685_v18 = vadd.f32 1.0, %v3128_v16 }
 0x3ca   :  { %3129 = vrcp.f32 %v685_v18 }
 0x3d4   :  { %v3130_v19 = vpop.eup %3129 }
 0x3d5   :  { %v689_v22 = vmul.f32 %v3130_v19, %v597_v3 }
 0x438   :  { %v692_v20 = vpop.permute.xlu1 %691 }
 0x439   :  { %v694_v21 = vmul.f32 %v3130_v19, %v692_v20 }
 0x43b   :  { %696 = vrot.lane.b32.xlu0 %v694_v21, %s3319_s28 }
 0x4ad   :  { %v697_v23 = vpop.permute.xlu0 %696 }
 0x4ae   :  { %v699_v24 = vadd.f32 %v697_v23, %v689_v22 }
 0x4b0   :  { %3131 = vtanh.f32 %v699_v24 }
 0x4ba   :  { %v3132_v25 = vpop.eup %3131 }
 0x4bb   :  { %702 = vrot.lane.b32.xlu1 %v3132_v25, %s3318_s2 }
 0x52d   :  { %v703_v26 = vpop.permute.xlu1 %702 }
 0x52e   :  { %v705_v27 = vmul.f32 %v3130_v19, %v703_v26 }
 0x530   :  { %707 = vrot.lane.b32.xlu0 %v705_v27, %s3319_s28 }
 0x5a2   :  { %v708_v28 = vpop.permute.xlu0 %707 }
 0x5a3   :  { %710 = vst.msk [vmem:[#allocation2 + $0x8] sm:$0xff] %vm501_vm4, %v708_v28  ;;  %2787 = vmatmul.mubr.msk.f32.vlgmr.msra.gmra.mrb[4].mxu1 %vm501_vm4, %v708_v28 }
 0x5a4   :  { %2994 = vmatpush3.bf16.msra.mxu1 %v3446_v12  ;;  %2797 = vmatprep.mubr.msk.f32.mxu1 %vm3316_vm2, %v3317_v9 }
 0x5a5   :  { %2995 = vmatprep.subr.bf16.mxu1 %v3315_v5 }
 0x5a8   :  { %2997 = vmatpush3.bf16.msra.mxu1 %v3462_v17 }
 0x5a9   :  { %2998 = vmatprep.subr.bf16.mxu1 %v3315_v5 }
 0x676   :  { %v779_v29 = vpop.f32.mrb[4].mxu1 }
 0x677   :  { %v783_v30 = vadd.f32 %v779_v29, %v3559_v47  ;;  %v2788_v31 = vpop.f32.mrb[5].mxu1 }
 0x679   :  { %3133 = vtanh.f32 %v783_v30  ;;  %v2539_v33 = vmul.f32 -1.442695, %v783_v30 }
 0x67b   :  { %3135 = vpow2.f32 %v2539_v33 }
 0x683   :  { %v3134_v32 = vpop.eup %3133 }
 0x684   :  { %793 = vrot.lane.b32.xlu1 %v3134_v32, %s3318_s2 }
 0x685   :  { %v3136_v34 = vpop.eup %3135 }
 0x686   :  { %v787_v35 = vadd.f32 1.0, %v3136_v34  ;;  %v1344_v34 = vld [vmem:[%s3919_s6 + $0x8] sm:$0xff] }
 0x688   :  { %3137 = vrcp.f32 %v787_v35 }
 0x692   :  { %v3138_v36 = vpop.eup %3137 }
 0x693   :  { %v791_v39 = vmul.f32 %v3138_v36, %v699_v24 }
 0x6f6   :  { %v794_v37 = vpop.permute.xlu1 %793 }
 0x6f7   :  { %v796_v38 = vmul.f32 %v3138_v36, %v794_v37 }
 0x6f9   :  { %798 = vrot.lane.b32.xlu0 %v796_v38, %s3319_s28 }
 0x76b   :  { %v799_v40 = vpop.permute.xlu0 %798 }
 0x76c   :  { %v801_v41 = vadd.f32 %v799_v40, %v791_v39  ;;  %v1345_v39 = vld [vmem:[%s3919_s6 + $0x10] sm:$0xff]  ;;  %v1346_v40 = vld [vmem:[%s3919_s6 + $0x18] sm:$0xff] }
 0x76e   :  { %3139 = vtanh.f32 %v801_v41 }
 0x778   :  { %v3140_v42 = vpop.eup %3139 }
 0x779   :  { %804 = vrot.lane.b32.xlu1 %v3140_v42, %s3318_s2 }
 0x7eb   :  { %v805_v43 = vpop.permute.xlu1 %804 }
 0x7ec   :  { %v807_v44 = vmul.f32 %v3138_v36, %v805_v43  ;;  %v1335_v43 = vld [vmem:[#allocation2] sm:$0xff] }
 0x7ee   :  { %809 = vrot.lane.b32.xlu0 %v807_v44, %s3319_s28  ;;  %v1336_v44 = vld [vmem:[#allocation2 + $0x8] sm:$0xff] }
 0x860   :  { %v810_v46 = vpop.permute.xlu0 %809 }
 0x861   :  { %812 = vst.msk [vmem:[#allocation2 + $0x10] sm:$0xff] %vm501_vm4, %v810_v46  ;;  %2798 = vmatmul.mubr.msk.f32.vlgmr.msra.gmra.mrb[6].mxu1 %vm501_vm4, %v810_v46 }
 0x862   :  { %3000 = vmatpush3.bf16.msra.mxu1 %v3446_v12  ;;  %2808 = vmatprep.mubr.msk.f32.mxu1 %vm3316_vm2, %v3317_v9 }
 0x863   :  { %3001 = vmatprep.subr.bf16.mxu1 %v3315_v5 }
 0x866   :  { %3003 = vmatpush3.bf16.msra.mxu1 %v3462_v17 }
 0x867   :  { %3004 = vmatprep.subr.bf16.mxu1 %v3315_v5 }
 0x868   :  { %v1337_v46 = vld [vmem:[#allocation2 + $0x10] sm:$0xff] }
 0x934   :  { %v881_v47 = vpop.f32.mrb[6].mxu1 }
 0x935   :  { %v885_v48 = vadd.f32 %v881_v47, %v3557_v45  ;;  %v2799_v50 = vpop.f32.mrb[7].mxu1 }
 0x937   :  { %3141 = vtanh.f32 %v885_v48  ;;  %v2541_v54 = vmul.f32 -1.442695, %v885_v48 }
 0x939   :  { %3143 = vpow2.f32 %v2541_v54 }
 0x941   :  { %v3142_v52 = vpop.eup %3141 }
 0x942   :  { %895 = vrot.lane.b32.xlu1 %v3142_v52, %s3318_s2 }
 0x943   :  { %v3144_v56 = vpop.eup %3143 }
 0x944   :  { %v889_v57 = vadd.f32 1.0, %v3144_v56 }
 0x946   :  { %3145 = vrcp.f32 %v889_v57 }
 0x950   :  { %v3146_v58 = vpop.eup %3145 }
 0x951   :  { %v893_v61 = vmul.f32 %v3146_v58, %v801_v41  ;;  %v3026_v41 = vpack.c.bf16 %v1346_v40, %v1345_v39 }
 0x9b4   :  { %v896_v59 = vpop.permute.xlu1 %895 }
 0x9b5   :  { %v898_v60 = vmul.f32 %v3146_v58, %v896_v59 }
 0x9b7   :  { %900 = vrot.lane.b32.xlu0 %v898_v60, %s3319_s28 }
 0xa29   :  { %v901_v62 = vpop.permute.xlu0 %900 }
 0xa2a   :  { %v903_v63 = vadd.f32 %v901_v62, %v893_v61 }
 0xa2c   :  { %3147 = vtanh.f32 %v903_v63 }
 0xa36   :  { %v3148_v45 = vpop.eup %3147 }
 0xa37   :  { %906 = vrot.lane.b32.xlu1 %v3148_v45, %s3318_s2 }
 0xaa9   :  { %v907_v0 = vpop.permute.xlu1 %906 }
 0xaaa   :  { %v909_v1 = vmul.f32 %v3146_v58, %v907_v0 }
 0xaac   :  { %911 = vrot.lane.b32.xlu0 %v909_v1, %s3319_s28 }
 0xb1e   :  { %v912_v2 = vpop.permute.xlu0 %911 }
 0xb1f   :  { %914 = vst.msk [vmem:[#allocation2 + $0x18] sm:$0xff] %vm501_vm4, %v912_v2  ;;  %2809 = vmatmul.mubr.msk.f32.vlgmr.msra.gmra.mrb[8].mxu1 %vm501_vm4, %v912_v2 }
 0xb20   :  { %3006 = vmatpush3.bf16.msra.mxu1 %v3446_v12  ;;  %2819 = vmatprep.mubr.msk.f32.mxu1 %vm3316_vm2, %v3317_v9 }
 0xb21   :  { %3007 = vmatprep.subr.bf16.mxu1 %v3315_v5 }
 0xb24   :  { %3009 = vmatpush3.bf16.msra.mxu1 %v3462_v17 }
 0xb25   :  { %3016 = vmatprep.subr.bf16.mxu1 %v3315_v5 }
 0xb26   :  { %v1338_v47 = vld [vmem:[#allocation2 + $0x18] sm:$0xff] }
 0xbf2   :  { %v983_v3 = vpop.f32.mrb[8].mxu1 }
 0xbf3   :  { %v987_v4 = vadd.f32 %v983_v3, %v3563_v51  ;;  %v2810_v6 = vpop.f32.mrb[9].mxu1 }
 0xbf5   :  { %3149 = vtanh.f32 %v987_v4  ;;  %v2543_v8 = vmul.f32 -1.442695, %v987_v4 }
 0xbf7   :  { %3151 = vpow2.f32 %v2543_v8 }
 0xbff   :  { %v3150_v7 = vpop.eup %3149 }
 0xc00   :  { %997 = vrot.lane.b32.xlu1 %v3150_v7, %s3318_s2 }
 0xc01   :  { %v3152_v10 = vpop.eup %3151 }
 0xc02   :  { %v991_v11 = vadd.f32 1.0, %v3152_v10  ;;  %v2560_v10 = vld [vmem:[%s3920_s7 + $0x20] sm:$0xff] }
 0xc04   :  { %3153 = vrcp.f32 %v991_v11  ;;  %v2561_v11 = vld [vmem:[%s3920_s7 + $0x28] sm:$0xff] }
 0xc0e   :  { %v3154_v13 = vpop.eup %3153 }
 0xc0f   :  { %v995_v16 = vmul.f32 %v3154_v13, %v903_v63 }
 0xc72   :  { %v998_v14 = vpop.permute.xlu1 %997 }
 0xc73   :  { %v1000_v15 = vmul.f32 %v3154_v13, %v998_v14  ;;  %v2562_v14 = vld [vmem:[%s3920_s7 + $0x30] sm:$0xff] }
 0xc75   :  { %1002 = vrot.lane.b32.xlu0 %v1000_v15, %s3319_s28  ;;  %v2563_v15 = vld [vmem:[%s3920_s7 + $0x38] sm:$0xff] }
 0xce7   :  { %v1003_v18 = vpop.permute.xlu0 %1002 }
 0xce8   :  { %v1005_v19 = vadd.f32 %v1003_v18, %v995_v16  ;;  %v3695_v16 = vpack.c.bf16 %v2563_v15, %v2562_v14 }
 0xcea   :  { %3155 = vtanh.f32 %v1005_v19 }
 0xcf4   :  { %v3156_v51 = vpop.eup %3155 }
 0xcf5   :  { %1008 = vrot.lane.b32.xlu1 %v3156_v51, %s3318_s2  ;;  %v2565_v51 = vld [vmem:[%s3923_s10 + $0x8] sm:$0xff] }
 0xd67   :  { %v1009_v20 = vpop.permute.xlu1 %1008 }
 0xd68   :  { %v1011_v21 = vmul.f32 %v3154_v13, %v1009_v20  ;;  %v3685_v13 = vpack.c.bf16 %v2561_v11, %v2560_v10 }
 0xd6a   :  { %1013 = vrot.lane.b32.xlu0 %v1011_v21, %s3319_s28  ;;  %v2564_v21 = vld [vmem:[%s3922_s9 + $0x8] sm:$0xff] }
 0xddc   :  { %v1014_v22 = vpop.permute.xlu0 %1013 }
 0xddd   :  { %1016 = vst.msk [vmem:[#allocation2 + $0x20] sm:$0xff] %vm501_vm4, %v1014_v22  ;;  %2820 = vmatmul.mubr.msk.f32.vlgmr.msra.gmra.mrb[10].mxu1 %vm501_vm4, %v1014_v22 }
 0xdde   :  { %3018 = vmatpush3.bf16.msra.mxu1 %v3446_v12  ;;  %2841 = vmatprep.mubr.msk.f32.mxu1 %vm3316_vm2, %v3317_v9 }
 0xddf   :  { %3019 = vmatprep.subr.bf16.mxu1 %v3315_v5 }
 0xde2   :  { %3021 = vmatpush3.bf16.msra.mxu1 %v3462_v17 }
 0xde3   :  { %3030 = vmatprep.subr.bf16.mxu1 %v3315_v5 }
 0xde4   :  { %v1339_v48 = vld [vmem:[#allocation2 + $0x20] sm:$0xff] }
 0xeb0   :  { %v1085_v23 = vpop.f32.mrb[10].mxu1 }
 0xeb1   :  { %v1089_v24 = vadd.f32 %v1085_v23, %v3561_v49  ;;  %v2821_v25 = vpop.f32.mrb[11].mxu1  ;;  %v1343_v49 = vld [vmem:[%s3919_s6] sm:$0xff] }
 0xeb2   :  { %v3022_v35 = vpack.c.bf16 %v1344_v34, %v1343_v49 }
 0xeb3   :  { %3157 = vtanh.f32 %v1089_v24  ;;  %v2545_v27 = vmul.f32 -1.442695, %v1089_v24 }
 0xeb4   :  { %3023 = vmatprep.subr.bf16.mxu0 %v3022_v35 }
 0xeb5   :  { %3159 = vpow2.f32 %v2545_v27 }
 0xebd   :  { %v3158_v26 = vpop.eup %3157 }
 0xebe   :  { %1099 = vrot.lane.b32.xlu1 %v3158_v26, %s3318_s2  ;;  %v3727_v26 = vld [vmem:[%s3921_s8 + $0x1] ss:$0 sm:$0xff] }
 0xebf   :  { %v3160_v12 = vpop.eup %3159 }
 0xec0   :  { %v1093_v28 = vadd.f32 1.0, %v3160_v12 }
 0xec2   :  { %3161 = vrcp.f32 %v1093_v28 }
 0xecc   :  { %v3162_v29 = vpop.eup %3161 }
 0xecd   :  { %v1097_v17 = vmul.f32 %v3162_v29, %v1005_v19 }
 0xf30   :  { %v1100_v30 = vpop.permute.xlu1 %1099 }
 0xf31   :  { %v1102_v31 = vmul.f32 %v3162_v29, %v1100_v30 }
 0xf33   :  { %1104 = vrot.lane.b32.xlu0 %v1102_v31, %s3319_s28 }
 0xfa5   :  { %v1105_v32 = vpop.permute.xlu0 %1104 }
 0xfa6   :  { %v1107_v33 = vadd.f32 %v1105_v32, %v1097_v17 }
 0xfa8   :  { %3163 = vtanh.f32 %v1107_v33 }
 0xfb2   :  { %v3164_v36 = vpop.eup %3163 }
 0xfb3   :  { %1110 = vrot.lane.b32.xlu1 %v3164_v36, %s3318_s2 }
0x1025   :  { %v1111_v37 = vpop.permute.xlu1 %1110 }
0x1026   :  { %v1113_v38 = vmul.f32 %v3162_v29, %v1111_v37 }
0x1028   :  { %1115 = vrot.lane.b32.xlu0 %v1113_v38, %s3319_s28 }
0x109a   :  { %v1116_v42 = vpop.permute.xlu0 %1115 }
0x109b   :  { %1118 = vst.msk [vmem:[#allocation2 + $0x28] sm:$0xff] %vm501_vm4, %v1116_v42  ;;  %2831 = vmatmul.mubr.msk.f32.vlgmr.msra.gmra.mrb[8].mxu0 %vm501_vm4, %v1116_v42 }
0x109c   :  { %3025 = vmatpush3.bf16.msra.mxu0 %v3022_v35  ;;  %2852 = vmatprep.mubr.msk.f32.mxu0 %vm501_vm4, %v1335_v43 }
0x109d   :  { %3027 = vmatprep.subr.bf16.mxu0 %v3026_v41 }
0x10a0   :  { %3029 = vmatpush3.bf16.msra.mxu0 %v3026_v41 }
0x10a1   :  { %3042 = vmatprep.subr.bf16.mxu0 %v3315_v5 }
0x10a2   :  { %v1340_v50 = vld [vmem:[#allocation2 + $0x28] sm:$0xff] }
0x10a3   :  { %2853 = vmatmul.mubr.msk.f32.vlgmr.msra.gmra.mrb[10].mxu0 %vm501_vm4, %v1336_v44 }
0x10a4   :  { %2855 = vmatprep.mubr.msk.f32.mxu0 %vm501_vm4, %v1337_v46  ;;  %3044 = vmatpush3.bf16.msra.mxu0 %v3685_v13 }
0x10a5   :  { %3045 = vmatprep.subr.bf16.mxu0 %v3315_v5 }
0x10a7   :  { %2856 = vmatmul.mubr.msk.f32.gmra.mrb[12].mxu0 %vm501_vm4, %v1338_v47 }
0x10a8   :  { %2858 = vmatprep.mubr.msk.f32.mxu0 %vm501_vm4, %v1339_v48  ;;  %3047 = vmatpush3.bf16.msra.mxu0 %v3695_v16 }
0x10a9   :  { %3054 = vmatprep.subr.bf16.mxu0 %v3315_v5 }
0x10ab   :  { %2859 = vmatmul.mubr.msk.f32.gmra.mrb[14].mxu0 %vm501_vm4, %v1340_v50 }
0x116e   :  { %v1187_v52 = vpop.f32.mrb[8].mxu0 }
0x116f   :  { %v1191_v54 = vadd.f32 %v1187_v52, %v3567_v55  ;;  %v2832_v56 = vpop.f32.mrb[9].mxu0 }
0x1171   :  { %3165 = vtanh.f32 %v1191_v54  ;;  %v2547_v45 = vmul.f32 -1.442695, %v1191_v54 }
0x1173   :  { %3167 = vpow2.f32 %v2547_v45 }
0x1176   :  { %v3663_v57 = vpop.f32.mrb[10].mxu0 }
0x1177   :  { %v1443_v58 = vpop.f32.mrb[11].mxu0 }
0x1178   :  { %v1444_v27 = vadd.f32 %v3727_v26, %v1443_v58 }
0x117a   :  { %v3665_v59 = vpop.f32.mrb[12].mxu0 }
0x117b   :  { %v3166_v60 = vpop.eup %3165  ;;  %v3667_v61 = vpop.f32.mrb[13].mxu0 }
0x117c   :  { %1201 = vrot.lane.b32.xlu1 %v3166_v60, %s3318_s2 }
0x117d   :  { %v3168_v0 = vpop.eup %3167 }
0x117e   :  { %v3670_v62 = vpop.f32.mrb[14].mxu0  ;;  %v1195_v55 = vadd.f32 1.0, %v3168_v0  ;;  %v1449_v0 = vadd.f32 %v3663_v57, %v3727_v26 }
0x117f   :  { %v3672_v63 = vpop.f32.mrb[15].mxu0 }
0x1180   :  { %3169 = vrcp.f32 %v1195_v55 }
0x118a   :  { %v3170_v1 = vpop.eup %3169 }
0x118b   :  { %v1199_v4 = vmul.f32 %v3170_v1, %v1107_v33 }
0x11ee   :  { %v1202_v2 = vpop.permute.xlu1 %1201 }
0x11ef   :  { %v1204_v3 = vmul.f32 %v3170_v1, %v1202_v2 }
0x11f1   :  { %1206 = vrot.lane.b32.xlu0 %v1204_v3, %s3319_s28 }
0x1263   :  { %v1207_v6 = vpop.permute.xlu0 %1206 }
0x1264   :  { %v3675_v7 = vadd.f32 %v1207_v6, %v1199_v4 }
0x1266   :  { %3171 = vtanh.f32 %v3675_v7 }
0x1270   :  { %v3172_v8 = vpop.eup %3171 }
0x1271   :  { %1212 = vrot.lane.b32.xlu1 %v3172_v8, %s3318_s2 }
0x12e3   :  { %v1213_v18 = vpop.permute.xlu1 %1212 }
0x12e4   :  { %v1215_v19 = vmul.f32 %v3170_v1, %v1213_v18 }
0x12e6   :  { %1217 = vrot.lane.b32.xlu0 %v1215_v19, %s3319_s28 }
0x12ea   :  { %1573 = vrot.lane.b32.xlu0 %v2565_v51, %s3319_s28 }
0x1358   :  { %v1218_v20 = vpop.permute.xlu0 %1217 }
0x1359   :  { %1220 = vst.msk [vmem:[#allocation2 + $0x30] sm:$0xff] %vm501_vm4, %v1218_v20  ;;  %2842 = vmatmul.mubr.msk.f32.vlgmr.msra.gmra.mrb[12].mxu1 %vm501_vm4, %v1218_v20 }
0x135a   :  { %3032 = vmatpush3.bf16.msra.mxu1 %v3685_v13  ;;  %2872 = vmatprep.mubr.msk.f32.mxu1 %vm3316_vm2, %v3317_v9 }
0x135b   :  { %3033 = vmatprep.subr.bf16.mxu1 %v3315_v5 }
0x135c   :  { %v1574_v34 = vpop.permute.xlu0 %1573 }
0x135e   :  { %3035 = vmatpush3.bf16.msra.mxu1 %v3695_v16 }
0x135f   :  { %3036 = vmatprep.subr.bf16.mxu1 %v3315_v5 }
0x1360   :  { %v1341_v22 = vld [vmem:[#allocation2 + $0x30] sm:$0xff] }
0x1361   :  { %2873 = vmatmul.mubr.msk.f32.vlgmr.msra.gmra.mrb[14].mxu1 %vm501_vm4, %v2564_v21  ;;  %2861 = vmatprep.mubr.msk.f32.mxu0 %vm501_vm4, %v1341_v22 }
0x1362   :  { %3038 = vmatpush3.bf16.msra.mxu1 %v3685_v13  ;;  %2883 = vmatprep.mubr.msk.f32.mxu1 %vm3316_vm2, %v3317_v9 }
0x1363   :  { %3039 = vmatprep.subr.bf16.mxu1 %v3315_v5 }
0x1366   :  { %3041 = vmatpush3.bf16.msra.mxu1 %v3695_v16 }
0x1367   :  { %3048 = vmatprep.subr.bf16.mxu1 %v3315_v5 }
0x142c   :  { %v1289_v23 = vpop.f32.mrb[12].mxu1 }
0x142d   :  { %v1293_v24 = vadd.f32 %v1289_v23, %v3565_v53  ;;  %v2843_v25 = vpop.f32.mrb[13].mxu1 }
0x142e   :  { %v1454_v25 = vadd.f32 %v3727_v26, %v3667_v61 }
0x142f   :  { %v2549_v40 = vmul.f32 -1.442695, %v1293_v24 }
0x1434   :  { %v1560_v12 = vpop.f32.mrb[14].mxu1 }
0x1435   :  { %v1564_v28 = vadd.f32 %v1560_v12, %v1444_v27  ;;  %v2874_v29 = vpop.f32.mrb[15].mxu1 }
0x1437   :  { %3173 = vtanh.f32 %v1564_v28  ;;  %v2567_v31 = vmul.f32 -1.442695, %v1564_v28 }
0x1439   :  { %3175 = vpow2.f32 %v2567_v31 }
0x1441   :  { %v3174_v30 = vpop.eup %3173 }
0x1442   :  { %1578 = vrot.lane.b32.xlu1 %v3174_v30, %s3318_s2 }
0x1443   :  { %v3176_v17 = vpop.eup %3175 }
0x1444   :  { %v1568_v32 = vadd.f32 1.0, %v3176_v17 }
0x1446   :  { %3177 = vrcp.f32 %v1568_v32 }
0x1450   :  { %v3178_v53 = vpop.eup %3177 }
0x1451   :  { %v1576_v35 = vmul.f32 %v3178_v53, %v1574_v34 }
0x14b4   :  { %v1579_v33 = vpop.permute.xlu1 %1578 }
0x14b5   :  { %v1581_v49 = vmul.f32 %v3178_v53, %v1579_v33 }
0x14b7   :  { %1583 = vrot.lane.b32.xlu1 %v1581_v49, %s3319_s28 }
0x1529   :  { %v1584_v36 = vpop.permute.xlu1 %1583 }
0x152a   :  { %v1586_v37 = vadd.f32 %v1584_v36, %v1576_v35 }
0x152c   :  { %3179 = vtanh.f32 %v1586_v37 }
0x152d   :  { %3181 = vtanh.f32 %v1293_v24 }
0x152e   :  { %3183 = vpow2.f32 %v2549_v40 }
0x1536   :  { %v3180_v38 = vpop.eup %3179 }
0x1537   :  { %1589 = vrot.lane.b32.xlu0 %v3180_v38, %s3318_s2  ;;  %v3182_v39 = vpop.eup %3181 }
0x1538   :  { %v3184_v41 = vpop.eup %3183 }
0x1539   :  { %v1297_v42 = vadd.f32 1.0, %v3184_v41 }
0x153b   :  { %1303 = vrot.lane.b32.xlu0 %v3182_v39, %s3318_s2  ;;  %3185 = vrcp.f32 %v1297_v42  ;;  %v1459_v39 = vadd.f32 %v3665_v59, %v3727_v26 }
0x1545   :  { %v3186_v46 = vpop.eup %3185 }
0x1546   :  { %v1301_v52 = vmul.f32 %v3186_v46, %v3675_v7 }
0x15a9   :  { %v1590_v43 = vpop.permute.xlu0 %1589 }
0x15aa   :  { %v1592_v44 = vmul.f32 %v3178_v53, %v1590_v43 }
0x15ac   :  { %1594 = vrot.lane.b32.xlu1 %v1592_v44, %s3319_s28 }
0x15ad   :  { %v1304_v47 = vpop.permute.xlu0 %1303 }
0x15ae   :  { %v1306_v48 = vmul.f32 %v3186_v46, %v1304_v47 }
0x15b0   :  { %1308 = vrot.lane.b32.xlu0 %v1306_v48, %s3319_s28 }
0x161e   :  { %v1595_v50 = vpop.permute.xlu1 %1594 }
0x161f   :  { %2884 = vmatmul.mubr.msk.f32.vlgmr.msra.gmra.mrb[16].mxu1 %vm501_vm4, %v1595_v50 }
0x1620   :  { %3050 = vmatpush3.bf16.msra.mxu1 %v3685_v13  ;;  %2905 = vmatprep.mubr.msk.f32.mxu1 %vm3316_vm2, %v3317_v9 }
0x1621   :  { %3051 = vmatprep.subr.bf16.mxu1 %v3315_v5 }
0x1622   :  { %v1309_v54 = vpop.permute.xlu0 %1308 }
0x1623   :  { %v3742_v56 = vadd.f32 %v1309_v54, %v1301_v52 }
0x1624   :  { %3053 = vmatpush3.bf16.msra.mxu1 %v3695_v16 }
0x1625   :  { %3187 = vtanh.f32 %v3742_v56  ;;  %3060 = vmatprep.subr.bf16.mxu1 %v3315_v5 }
0x162f   :  { %v3188_v58 = vpop.eup %3187 }
0x1630   :  { %1314 = vrot.lane.b32.xlu0 %v3188_v58, %s3318_s2 }
0x16a2   :  { %v1315_v60 = vpop.permute.xlu0 %1314 }
0x16a3   :  { %v1317_v45 = vmul.f32 %v3186_v46, %v1315_v60 }
0x16a5   :  { %1319 = vrot.lane.b32.xlu0 %v1317_v45, %s3319_s28 }
0x16f2   :  { %v1664_v55 = vpop.f32.mrb[16].mxu1 }
0x16f3   :  { %v1668_v1 = vadd.f32 %v1664_v55, %v1449_v0  ;;  %v2885_v2 = vpop.f32.mrb[17].mxu1 }
0x16f5   :  { %3189 = vtanh.f32 %v1668_v1  ;;  %v2569_v57 = vmul.f32 -1.442695, %v1668_v1  ;;  %v1464_v1 = vadd.f32 %v3727_v26, %v3672_v63 }
0x16f7   :  { %3191 = vpow2.f32 %v2569_v57 }
0x16ff   :  { %v3190_v3 = vpop.eup %3189 }
0x1700   :  { %1678 = vrot.lane.b32.xlu1 %v3190_v3, %s3318_s2 }
0x1701   :  { %v3192_v7 = vpop.eup %3191 }
0x1702   :  { %v1672_v8 = vadd.f32 1.0, %v3192_v7 }
0x1704   :  { %3193 = vrcp.f32 %v1672_v8 }
0x170e   :  { %v3194_v10 = vpop.eup %3193 }
0x170f   :  { %v1676_v15 = vmul.f32 %v3194_v10, %v1586_v37 }
0x1717   :  { %v3752_v4 = vpop.permute.xlu0 %1319 }
0x1718   :  { %1322 = vst.msk [vmem:[#allocation2 + $0x38] sm:$0xff] %vm501_vm4, %v3752_v4  ;;  %1323 = vst.msk [vmem:[#allocation5] sm:$0xff] %vm501_vm4, %v3752_v4 }
0x171f   :  { %v1342_v6 = vld [vmem:[#allocation2 + $0x38] sm:$0xff] }
0x1720   :  { %2862 = vmatmul.mubr.msk.f32.gmra.mrb[16].mxu0 %vm501_vm4, %v1342_v6 }
0x1721   :  { %2894 = vmatprep.mubr.msk.f32.mxu0 %vm3316_vm2, %v3317_v9 }
0x1772   :  { %v1679_v11 = vpop.permute.xlu1 %1678 }
0x1773   :  { %v1681_v14 = vmul.f32 %v3194_v10, %v1679_v11 }
0x1775   :  { %1683 = vrot.lane.b32.xlu1 %v1681_v14, %s3319_s28 }
0x17e7   :  { %v1684_v18 = vpop.permute.xlu1 %1683 }
0x17e8   :  { %v1686_v19 = vadd.f32 %v1684_v18, %v1676_v15 }
0x17ea   :  { %3195 = vtanh.f32 %v1686_v19 }
0x17f3   :  { %v3762_v51 = vpop.f32.mrb[16].mxu0 }
0x17f4   :  { %v3196_v20 = vpop.eup %3195  ;;  %v3764_v21 = vpop.f32.mrb[17].mxu0 }
0x17f5   :  { %1689 = vrot.lane.b32.xlu1 %v3196_v20, %s3318_s2 }
0x1867   :  { %v1690_v22 = vpop.permute.xlu1 %1689 }
0x1868   :  { %v1692_v23 = vmul.f32 %v3194_v10, %v1690_v22 }
0x186a   :  { %1694 = vrot.lane.b32.xlu1 %v1692_v23, %s3319_s28 }
0x18dc   :  { %v1695_v24 = vpop.permute.xlu1 %1694 }
0x18dd   :  { %2895 = vmatmul.mubr.msk.f32.vlgmr.msra.gmra.mrb[18].mxu0 %vm501_vm4, %v1695_v24 }
0x18de   :  { %3056 = vmatpush3.bf16.msra.mxu0 %v3685_v13  ;;  %2916 = vmatprep.mubr.msk.f32.mxu0 %vm3316_vm2, %v3317_v9 }
0x18df   :  { %3057 = vmatprep.subr.bf16.mxu0 %v3315_v5 }
0x18e2   :  { %3059 = vmatpush3.bf16.msra.mxu0 %v3695_v16 }
0x18e3   :  { %3066 = vmatprep.subr.bf16.mxu0 %v3315_v5 }
0x19b0   :  { %v1764_v27 = vpop.f32.mrb[18].mxu0 }
0x19b1   :  { %v1768_v12 = vadd.f32 %v1764_v27, %v1454_v25  ;;  %v2896_v28 = vpop.f32.mrb[19].mxu0  ;;  %v1469_v25 = vadd.f32 %v3670_v62, %v3727_v26 }
0x19b3   :  { %3197 = vtanh.f32 %v1768_v12  ;;  %v2571_v30 = vmul.f32 -1.442695, %v1768_v12 }
0x19b5   :  { %3199 = vpow2.f32 %v2571_v30 }
0x19bd   :  { %v3198_v29 = vpop.eup %3197 }
0x19be   :  { %1778 = vrot.lane.b32.xlu0 %v3198_v29, %s3318_s2 }
0x19bf   :  { %v3200_v31 = vpop.eup %3199 }
0x19c0   :  { %v1772_v17 = vadd.f32 1.0, %v3200_v31 }
0x19c2   :  { %3201 = vrcp.f32 %v1772_v17 }
0x19cc   :  { %v3202_v32 = vpop.eup %3201 }
0x19cd   :  { %v1776_v49 = vmul.f32 %v3202_v32, %v1686_v19 }
0x1a30   :  { %v1779_v53 = vpop.permute.xlu0 %1778 }
0x1a31   :  { %v1781_v33 = vmul.f32 %v3202_v32, %v1779_v53 }
0x1a33   :  { %1783 = vrot.lane.b32.xlu1 %v1781_v33, %s3319_s28 }
0x1aa5   :  { %v1784_v34 = vpop.permute.xlu1 %1783 }
0x1aa6   :  { %v1786_v61 = vadd.f32 %v1784_v34, %v1776_v49 }
0x1aa8   :  { %3203 = vtanh.f32 %v1786_v61 }
0x1ab2   :  { %v3204_v35 = vpop.eup %3203 }
0x1ab3   :  { %1789 = vrot.lane.b32.xlu0 %v3204_v35, %s3318_s2 }
0x1b25   :  { %v1790_v36 = vpop.permute.xlu0 %1789 }
0x1b26   :  { %v1792_v37 = vmul.f32 %v3202_v32, %v1790_v36  ;;  %v1474_v36 = vadd.f32 %v3727_v26, %v3764_v21 }
0x1b28   :  { %1794 = vrot.lane.b32.xlu1 %v1792_v37, %s3319_s28 }
0x1b9a   :  { %v1795_v38 = vpop.permute.xlu1 %1794 }
0x1b9b   :  { %2906 = vmatmul.mubr.msk.f32.vlgmr.msra.gmra.mrb[18].mxu1 %vm501_vm4, %v1795_v38 }
0x1b9c   :  { %3062 = vmatpush3.bf16.msra.mxu1 %v3685_v13  ;;  %2927 = vmatprep.mubr.msk.f32.mxu1 %vm3316_vm2, %v3317_v9 }
0x1b9d   :  { %3063 = vmatprep.subr.bf16.mxu1 %v3315_v5 }
0x1ba0   :  { %3065 = vmatpush3.bf16.msra.mxu1 %v3695_v16 }
0x1ba1   :  { %3072 = vmatprep.subr.bf16.mxu1 %v3315_v5 }
0x1c6e   :  { %v1864_v40 = vpop.f32.mrb[18].mxu1 }
0x1c6f   :  { %v1868_v41 = vadd.f32 %v1864_v40, %v1459_v39  ;;  %v2907_v42 = vpop.f32.mrb[19].mxu1 }
0x1c71   :  { %3205 = vtanh.f32 %v1868_v41  ;;  %v2573_v44 = vmul.f32 -1.442695, %v1868_v41 }
0x1c73   :  { %3207 = vpow2.f32 %v2573_v44 }
0x1c7b   :  { %v3206_v43 = vpop.eup %3205 }
0x1c7c   :  { %1878 = vrot.lane.b32.xlu0 %v3206_v43, %s3318_s2 }
0x1c7d   :  { %v3208_v46 = vpop.eup %3207 }
0x1c7e   :  { %v1872_v47 = vadd.f32 1.0, %v3208_v46 }
0x1c80   :  { %3209 = vrcp.f32 %v1872_v47 }
0x1c8a   :  { %v3210_v48 = vpop.eup %3209 }
0x1c8b   :  { %v1876_v54 = vmul.f32 %v3210_v48, %v1786_v61 }
0x1cee   :  { %v1879_v50 = vpop.permute.xlu0 %1878 }
0x1cef   :  { %v1881_v52 = vmul.f32 %v3210_v48, %v1879_v50 }
0x1cf1   :  { %1883 = vrot.lane.b32.xlu1 %v1881_v52, %s3319_s28 }
0x1d63   :  { %v1884_v58 = vpop.permute.xlu1 %1883 }
0x1d64   :  { %v1886_v59 = vadd.f32 %v1884_v58, %v1876_v54 }
0x1d66   :  { %3211 = vtanh.f32 %v1886_v59 }
0x1d70   :  { %v3212_v60 = vpop.eup %3211 }
0x1d71   :  { %1889 = vrot.lane.b32.xlu0 %v3212_v60, %s3318_s2  ;;  %v1330_v60 = vld [vmem:[%s3924_s11 + $0x8] sm:$0xff] }
0x1de3   :  { %v1890_v45 = vpop.permute.xlu0 %1889 }
0x1de4   :  { %v1892_v0 = vmul.f32 %v3210_v48, %v1890_v45 }
0x1de6   :  { %1894 = vrot.lane.b32.xlu1 %v1892_v0, %s3319_s28  ;;  %v1331_v0 = vld [vmem:[%s3924_s11 + $0x10] sm:$0xff] }
0x1e58   :  { %v1895_v55 = vpop.permute.xlu1 %1894 }
0x1e59   :  { %2917 = vmatmul.mubr.msk.f32.vlgmr.msra.gmra.mrb[20].mxu0 %vm501_vm4, %v1895_v55  ;;  %v1332_v55 = vld [vmem:[%s3924_s11 + $0x18] sm:$0xff] }
0x1e5a   :  { %3068 = vmatpush3.bf16.msra.mxu0 %v3685_v13  ;;  %2938 = vmatprep.mubr.msk.f32.mxu0 %vm3316_vm2, %v3317_v9 }
0x1e5b   :  { %3069 = vmatprep.subr.bf16.mxu0 %v3315_v5 }
0x1e5e   :  { %3071 = vmatpush3.bf16.msra.mxu0 %v3695_v16 }
0x1e5f   :  { %3078 = vmatprep.subr.bf16.mxu0 %v3315_v5 }
0x1f2c   :  { %v1964_v2 = vpop.f32.mrb[20].mxu0 }
0x1f2d   :  { %v1968_v3 = vadd.f32 %v1964_v2, %v1464_v1  ;;  %v2918_v6 = vpop.f32.mrb[21].mxu0  ;;  %v3088_v2 = vpack.c.bf16 %v1332_v55, %v1331_v0 }
0x1f2f   :  { %3213 = vtanh.f32 %v1968_v3  ;;  %v2575_v7 = vmul.f32 -1.442695, %v1968_v3  ;;  %v1479_v3 = vadd.f32 %v3762_v51, %v3727_v26 }
0x1f31   :  { %3215 = vpow2.f32 %v2575_v7 }
0x1f39   :  { %v3214_v57 = vpop.eup %3213 }
0x1f3a   :  { %1978 = vrot.lane.b32.xlu0 %v3214_v57, %s3318_s2 }
0x1f3b   :  { %v3216_v8 = vpop.eup %3215 }
0x1f3c   :  { %v1972_v10 = vadd.f32 1.0, %v3216_v8 }
0x1f3e   :  { %3217 = vrcp.f32 %v1972_v10 }
0x1f48   :  { %v3218_v11 = vpop.eup %3217 }
0x1f49   :  { %v1976_v18 = vmul.f32 %v3218_v11, %v1886_v59  ;;  %v1329_v59 = vld [vmem:[%s3924_s11] sm:$0xff] }
0x1f4a   :  { %v3085_v45 = vpack.c.bf16 %v1330_v60, %v1329_v59 }
0x1fac   :  { %v1979_v14 = vpop.permute.xlu0 %1978 }
0x1fad   :  { %v1981_v15 = vmul.f32 %v3218_v11, %v1979_v14 }
0x1faf   :  { %1983 = vrot.lane.b32.xlu1 %v1981_v15, %s3319_s28 }
0x2021   :  { %v1984_v19 = vpop.permute.xlu1 %1983 }
0x2022   :  { %v1986_v63 = vadd.f32 %v1984_v19, %v1976_v18 }
0x2024   :  { %3219 = vtanh.f32 %v1986_v63 }
0x202e   :  { %v3220_v20 = vpop.eup %3219 }
0x202f   :  { %1989 = vrot.lane.b32.xlu0 %v3220_v20, %s3318_s2  ;;  %v2305_v20 = vld [vmem:[%s3924_s11 + $0x20] sm:$0xff] }
0x20a1   :  { %v1990_v22 = vpop.permute.xlu0 %1989 }
0x20a2   :  { %v1992_v23 = vmul.f32 %v3218_v11, %v1990_v22  ;;  %v2306_v22 = vld [vmem:[%s3924_s11 + $0x28] sm:$0xff] }
0x20a4   :  { %1994 = vrot.lane.b32.xlu1 %v1992_v23, %s3319_s28  ;;  %v2307_v23 = vld [vmem:[%s3924_s11 + $0x30] sm:$0xff] }
0x2116   :  { %v1995_v24 = vpop.permute.xlu1 %1994 }
0x2117   :  { %2928 = vmatmul.mubr.msk.f32.vlgmr.msra.gmra.mrb[20].mxu1 %vm501_vm4, %v1995_v24  ;;  %v3079_v24 = vpack.c.bf16 %v2306_v22, %v2305_v20 }
0x2118   :  { %3074 = vmatpush3.bf16.msra.mxu1 %v3685_v13  ;;  %2949 = vmatprep.mubr.msk.f32.mxu1 %vm3316_vm2, %v3317_v9 }
0x2119   :  { %3075 = vmatprep.subr.bf16.mxu1 %v3315_v5 }
0x211c   :  { %3077 = vmatpush3.bf16.msra.mxu1 %v3695_v16 }
0x211d   :  { %3084 = vmatprep.subr.bf16.mxu1 %v3315_v5 }
0x21ea   :  { %v2064_v27 = vpop.f32.mrb[20].mxu1 }
0x21eb   :  { %v2068_v12 = vadd.f32 %v2064_v27, %v1469_v25  ;;  %v2929_v28 = vpop.f32.mrb[21].mxu1  ;;  %v2308_v25 = vld [vmem:[%s3924_s11 + $0x38] sm:$0xff]  ;;  %s3321_s11 = smov [#allocation5]  }
0x21ec   :  { %v3082_v27 = vpack.c.bf16 %v2308_v25, %v2307_v23 }
0x21ed   :  { %3221 = vtanh.f32 %v2068_v12  ;;  %v2577_v13 = vmul.f32 -1.442695, %v2068_v12 }
0x21ef   :  { %3223 = vpow2.f32 %v2577_v13 }
0x21f7   :  { %v3222_v29 = vpop.eup %3221 }
0x21f8   :  { %2078 = vrot.lane.b32.xlu0 %v3222_v29, %s3318_s2 }
0x21f9   :  { %v3224_v30 = vpop.eup %3223 }
0x21fa   :  { %v2072_v31 = vadd.f32 1.0, %v3224_v30 }
0x21fc   :  { %3225 = vrcp.f32 %v2072_v31 }
0x2206   :  { %v3226_v17 = vpop.eup %3225 }
0x2207   :  { %v2076_v53 = vmul.f32 %v3226_v17, %v1986_v63 }
0x226a   :  { %v2079_v32 = vpop.permute.xlu0 %2078 }
0x226b   :  { %v2081_v16 = vmul.f32 %v3226_v17, %v2079_v32 }
0x226d   :  { %2083 = vrot.lane.b32.xlu1 %v2081_v16, %s3319_s28 }
0x22df   :  { %v2084_v33 = vpop.permute.xlu1 %2083 }
0x22e0   :  { %v2086_v62 = vadd.f32 %v2084_v33, %v2076_v53 }
0x22e2   :  { %3227 = vtanh.f32 %v2086_v62 }
0x22ec   :  { %v3228_v49 = vpop.eup %3227 }
0x22ed   :  { %2089 = vrot.lane.b32.xlu0 %v3228_v49, %s3318_s2 }
0x235f   :  { %v2090_v34 = vpop.permute.xlu0 %2089 }
0x2360   :  { %v2092_v61 = vmul.f32 %v3226_v17, %v2090_v34 }
0x2362   :  { %2094 = vrot.lane.b32.xlu1 %v2092_v61, %s3319_s28 }
0x23d4   :  { %v2095_v35 = vpop.permute.xlu1 %2094 }
0x23d5   :  { %2939 = vmatmul.mubr.msk.f32.vlgmr.msra.gmra.mrb[22].mxu0 %vm501_vm4, %v2095_v35 }
0x23d6   :  { %2960 = vmatprep.mubr.msk.f32.mxu0 %vm3316_vm2, %v3317_v9  ;;  %3080 = vmatpush3.bf16.msra.mxu0 %v3079_v24 }
0x23d7   :  { %3081 = vmatprep.subr.bf16.mxu0 %v3315_v5 }
0x23da   :  { %3083 = vmatpush3.bf16.msra.mxu0 %v3082_v27 }
0x24a8   :  { %v2164_v37 = vpop.f32.mrb[22].mxu0 }
0x24a9   :  { %v2168_v38 = vadd.f32 %v2164_v37, %v1474_v36  ;;  %v2940_v39 = vpop.f32.mrb[23].mxu0 }
0x24ab   :  { %3229 = vtanh.f32 %v2168_v38  ;;  %v2579_v41 = vmul.f32 -1.442695, %v2168_v38 }
0x24ad   :  { %3231 = vpow2.f32 %v2579_v41 }
0x24b5   :  { %v3230_v40 = vpop.eup %3229 }
0x24b6   :  { %2178 = vrot.lane.b32.xlu0 %v3230_v40, %s3318_s2 }
0x24b7   :  { %v3232_v42 = vpop.eup %3231 }
0x24b8   :  { %v2172_v43 = vadd.f32 1.0, %v3232_v42 }
0x24ba   :  { %3233 = vrcp.f32 %v2172_v43 }
0x24c4   :  { %v3234_v44 = vpop.eup %3233 }
0x24c5   :  { %v2176_v48 = vmul.f32 %v3234_v44, %v2086_v62 }
0x2528   :  { %v2179_v46 = vpop.permute.xlu0 %2178 }
0x2529   :  { %v2181_v47 = vmul.f32 %v3234_v44, %v2179_v46 }
0x252b   :  { %2183 = vrot.lane.b32.xlu1 %v2181_v47, %s3319_s28 }
0x259d   :  { %v2184_v50 = vpop.permute.xlu1 %2183 }
0x259e   :  { %v2186_v21 = vadd.f32 %v2184_v50, %v2176_v48 }
0x25a0   :  { %3235 = vtanh.f32 %v2186_v21 }
0x25aa   :  { %v3236_v52 = vpop.eup %3235 }
0x25ab   :  { %2189 = vrot.lane.b32.xlu0 %v3236_v52, %s3318_s2 }
0x261d   :  { %v2190_v54 = vpop.permute.xlu0 %2189 }
0x261e   :  { %v2192_v58 = vmul.f32 %v3234_v44, %v2190_v54 }
0x2620   :  { %2194 = vrot.lane.b32.xlu1 %v2192_v58, %s3319_s28 }
0x2692   :  { %v2195_v1 = vpop.permute.xlu1 %2194 }
0x2693   :  { %2950 = vmatmul.mubr.msk.f32.vlgmr.msra.gmra.mrb[22].mxu1 %vm501_vm4, %v2195_v1 }
0x2694   :  { %3086 = vmatpush3.bf16.msra.mxu1 %v3085_v45  ;;  %2971 = vmatprep.mubr.msk.f32.mxu1 %vm3316_vm2, %v3317_v9 }
0x2695   :  { %3087 = vmatprep.subr.bf16.mxu1 %v3315_v5 }
0x2698   :  { %3089 = vmatpush3.bf16.msra.mxu1 %v3088_v2 }
0x269b   :  { %2972 = vmatmul.mubr.msk.f32.vlgmr.msra.gmra.mrb[24].mxu1 %vm501_vm4, %v3752_v4 }
0x2766   :  { %v2264_v6 = vpop.f32.mrb[22].mxu1 }
0x2767   :  { %v2268_v57 = vadd.f32 %v2264_v6, %v1479_v3  ;;  %v2951_v7 = vpop.f32.mrb[23].mxu1 }
0x2769   :  { %3237 = vtanh.f32 %v2268_v57  ;;  %v2581_v9 = vmul.f32 -1.442695, %v2268_v57 }
0x276b   :  { %3239 = vpow2.f32 %v2581_v9 }
0x276e   :  { %v3849_v8 = vpop.f32.mrb[24].mxu1 }
0x276f   :  { %v2973_v10 = vpop.f32.mrb[25].mxu1 }
0x2773   :  { %v3238_v11 = vpop.eup %3237 }
0x2774   :  { %2278 = vrot.lane.b32.xlu0 %v3238_v11, %s3318_s2 }
0x2775   :  { %v3240_v14 = vpop.eup %3239 }
0x2776   :  { %v2272_v15 = vadd.f32 1.0, %v3240_v14 }
0x2778   :  { %3241 = vrcp.f32 %v2272_v15 }
0x2782   :  { %v3242_v18 = vpop.eup %3241 }
0x2783   :  { %v2276_v26 = vmul.f32 %v3242_v18, %v2186_v21 }
0x27e6   :  { %v2279_v4 = vpop.permute.xlu0 %2278 }
0x27e7   :  { %v2281_v19 = vmul.f32 %v3242_v18, %v2279_v4 }
0x27e9   :  { %2283 = vrot.lane.b32.xlu1 %v2281_v19, %s3319_s28 }
0x285b   :  { %v2284_v51 = vpop.permute.xlu1 %2283 }
0x285c   :  { %v2286_v63 = vadd.f32 %v2284_v51, %v2276_v26 }
0x285e   :  { %3243 = vtanh.f32 %v2286_v63 }
0x2868   :  { %v3244_v12 = vpop.eup %3243 }
0x2869   :  { %2289 = vrot.lane.b32.xlu0 %v3244_v12, %s3318_s2  ;;  %s2477_s2 = sshll.u32 %s3321_s11, 4  ;;  %s2478_s2 = int_to_ptr.vmem [resolvable:$true] %s2477_s2 }
0x286a   :  { %s3245_s24 = scalar_lea.vmem %s2478_s2, 256  ;;  %p3250_p1 = scmp.lt.s32.totalorder %s2478_s2, %s2478_s2 }
0x286b   :  { %p3246_p0 = scmp.ne.s32.totalorder %s2478_s2, %s3245_s24  ;;  %p3251_p2 = scmp.lt.s32.totalorder %s3245_s24, %s3245_s24 }
0x286d   :  { %1325 = vrot.lane.b32.xlu0 %v3742_v56, %s3320_s23  ;;  %p3252_p3 = por %p3251_p2, %p3250_p1 }
0x286f   :  { %p3253_p4 = pnand %p3252_p3, %p3246_p0 }
0x28db   :  { %v2290_v28 = vpop.permute.xlu0 %2289 }
0x28dc   :  { %v2292_v29 = vmul.f32 %v3242_v18, %v2290_v28 }
0x28de   :  { %2294 = vrot.lane.b32.xlu1 %v2292_v29, %s3319_s28 }
0x28df   :  { %v1326_v13 = vpop.permute.xlu0 %1325 }
0x28e0   :  { %1328 = vst.msk [vmem:[#allocation7] sm:$0xff] %vm501_vm4, %v1326_v13 }
0x28e2   :  { %2300 = vrot.lane.b32.xlu1 %v2286_v63, %s3320_s23 }
0x2950   :  { %v2295_v30 = vpop.permute.xlu1 %2294 }
0x2951   :  { %2298 = vst.msk [vmem:[#allocation5 + $0x8] sm:$0xff] %vm501_vm4, %v2295_v30  ;;  %2961 = vmatmul.mubr.msk.f32.vlgmr.msra.gmra.mrb[24].mxu0 %vm501_vm4, %v2295_v30 }
0x2954   :  { %v2301_v5 = vpop.permute.xlu1 %2300 }
0x2955   :  { %2304 = vst.msk [vmem:[#allocation7 + $0x8] sm:$0xff] %vm501_vm4, %v2301_v5 }
0x2956   :  { %3256 = shalt.err (!%p3253_p4)
}
0x2957   :  { %s3257_s26 = scalar_lea.hbm %s3927_s14, 256 }
0x2958   :  { %p3258_p5 = scmp.ne.s32.totalorder %s3927_s14, %s3257_s26  ;;  %p3261_p6 = scmp.lt.u32.totalorder %s3257_s26, %s3927_s14 }
0x295a   :  { %p3263_p7 = pnand %p3261_p6, %p3258_p5 }
0x295c   :  { %3266 = shalt.err (!%p3263_p7)
}
0x295d   :  { %s3322_s8 = smov 128   ;;  %s3323_s27 = smov 8  }
0x295e   :  { %2483 = dma.vmem_to_hbm [thread:$0]  %s2478_s2, 256, %s3927_s14, [#allocation6], %s3322_s8, %s3322_s8, %s3323_s27  }
0x295f   :  { %s3324_s30 = smov [#allocation7]  }
0x2960   :  { %s2489_s16 = sshll.u32 %s3324_s30, 4  ;;  %s2490_s16 = int_to_ptr.vmem [resolvable:$true] %s2489_s16 }
0x2961   :  { %s3267_s17 = scalar_lea.vmem %s2490_s16, 256  ;;  %p3272_p9 = scmp.lt.s32.totalorder %s2490_s16, %s2490_s16 }
0x2962   :  { %p3268_p8 = scmp.ne.s32.totalorder %s2490_s16, %s3267_s17  ;;  %p3273_p10 = scmp.lt.s32.totalorder %s3267_s17, %s3267_s17 }
0x2964   :  { %p3274_p11 = por %p3273_p10, %p3272_p9 }
0x2966   :  { %p3275_p12 = pnand %p3274_p11, %p3268_p8 }
0x2968   :  { %3278 = shalt.err (!%p3275_p12)
}
0x2969   :  { %s3279_s18 = scalar_lea.hbm %s3928_s15, 256 }
0x296a   :  { %p3280_p13 = scmp.ne.s32.totalorder %s3928_s15, %s3279_s18  ;;  %p3283_p0 = scmp.lt.u32.totalorder %s3279_s18, %s3928_s15 }
0x296c   :  { %p3285_p1 = pnand %p3283_p0, %p3280_p13 }
0x296e   :  { %3288 = shalt.err (!%p3285_p1)
}
0x296f   :  { %2495 = dma.vmem_to_hbm [thread:$0]  %s2490_s16, 256, %s3928_s15, [#allocation6], %s3322_s8, %s3322_s8, %s3323_s27  }
0x2970   :  { %v2584_v31 = vld [vmem:[%s3925_s12] ss:$0 sm:$0xff]  ;;  %s3325_s11 = smov [#allocation3]  }
0x2971   :  { %s2468_s2 = sshll.u32 %s3325_s11, 4  ;;  %s2469_s2 = int_to_ptr.vmem [resolvable:$true] %s2468_s2 }
0x2972   :  { %s3289_s24 = scalar_lea.vmem %s2469_s2, 128  ;;  %p3294_p3 = scmp.lt.s32.totalorder %s2469_s2, %s2469_s2 }
0x2973   :  { %p3290_p2 = scmp.ne.s32.totalorder %s2469_s2, %s3289_s24  ;;  %p3295_p4 = scmp.lt.s32.totalorder %s3289_s24, %s3289_s24 }
0x2975   :  { %p3296_p5 = por %p3295_p4, %p3294_p3 }
0x2977   :  { %p3297_p6 = pnand %p3296_p5, %p3290_p2 }
0x2a24   :  { %v2377_v56 = vpop.f32.mrb[24].mxu0 }
0x2a25   :  { %v2450_v17 = vadd.f32 %v3849_v8, %v2377_v56  ;;  %v2962_v32 = vpop.f32.mrb[25].mxu0 }
0x2a27   :  { %v2460_v16 = vadd.f32 %v2584_v31, %v2450_v17 }
0x2a29   :  { %2461 = vst [vmem:[#allocation3] sm:$0xff] %v2460_v16 }
0x2a2a   :  { %3300 = shalt.err (!%p3297_p6)
}
0x2a2b   :  { %s3301_s25 = scalar_lea.hbm %s3926_s13, 128 }
0x2a2c   :  { %p3302_p7 = scmp.ne.s32.totalorder %s3926_s13, %s3301_s25  ;;  %p3305_p8 = scmp.lt.u32.totalorder %s3301_s25, %s3926_s13 }
0x2a2e   :  { %p3307_p9 = pnand %p3305_p8, %p3302_p7 }
0x2a30   :  { %3310 = shalt.err (!%p3307_p9)
}
0x2a31   :  { %2471 = dma.vmem_to_hbm [thread:$0]  %s2469_s2, 128, %s3926_s13, [#allocation4]  }
0x2a32   :  { %3311 = dma.done.wait [#allocation4], 128  }
0x2a33   :  { %3312 = vsyncadd [#allocation4], 4294967168 }
0x2a34   :  { %3313 = dma.done.wait [#allocation6], 512  }
0x2a35   :  { %3314 = vsyncadd [#allocation6], 4294966784 }
0x2a36   :  { %2505 = vsyncpa [#allocation4], 1 }
0x2a37   :  { %2506 = vsyncpa [#allocation6], 1 }

</bundles_post_ra>
